<compile_context>
chip_gen: v6e
topology: v6e:2x2x1
jax: 0.10.0
libtpu: 0.0.40
codegen_flags: <defaults>
</compile_context>

<pallas_src>
import jax
import jax.numpy as jnp
import numpy as np
from jax import lax
from jax.experimental import pallas as pl
from jax.experimental.pallas import tpu as pltpu


MXU_INPUT_DTYPE = jnp.float32   # set jnp.bfloat16 on v5e/v6e/v7x
STACK_DTYPE = jnp.float32       # set jnp.bfloat16 on v7x at realistic H,W


# ---------------------------------------------------------------------------
# Fused RDB kernel
# ---------------------------------------------------------------------------
def _make_rdb_kernel(C, G0, G, Ctot, H, W, guard, compute_dtype):
    Hp, Wp = H + 2, W + 2
    L = Hp * Wp

    def kernel(*refs):
        x_ref = refs[0]                    # (1, G0, L)  padded-flat input image
        mask_ref = refs[1]                 # (1, L)      1.0 interior / 0.0 pad
        conv_refs = refs[2:2 + 2 * C]      # per layer: (9, G, cin), (G, 1)
        wlff_ref = refs[2 + 2 * C]         # (G0, Ctot)
        blff_ref = refs[3 + 2 * C]         # (G0, 1)
        o_ref = refs[4 + 2 * C]            # (1, G0, L)
        fpad = refs[5 + 2 * C]             # VMEM scratch (Ctot, LG): dense stack

        # ---- init the persistent padded feature stack ---------------------
        # Guard bands are the only cells a shifted tap window can reach that
        # the per-step writes below do not cover; zero them (cheap).
        fpad[:, 0:guard] = jnp.zeros((Ctot, guard), fpad.dtype)
        fpad[:, guard + L:guard + L + guard] = jnp.zeros((Ctot, guard), fpad.dtype)

        x_val = x_ref[0].astype(jnp.float32)               # (G0, L), pads already 0
        fpad[0:G0, guard:guard + L] = x_val.astype(fpad.dtype)

        mask = mask_ref[...].astype(jnp.float32)           # (1, L)

        # ---- dense layers: 3x3 conv + ReLU; "concat" == channel-slice write
        # C is small and cin differs per layer -> static unrolled loop; only
        # the (G, L) accumulator is live across the tap loop.
        for c in range(C):
            w_ref = conv_refs[2 * c]
            b_ref = conv_refs[2 * c + 1]
            cin = G0 + c * G

            acc = jnp.zeros((G, L), jnp.float32)
            for ky in range(3):
                for kx in range(3):
                    tap = ky * 3 + kx
                    start = guard + (ky - 1) * Wp + (kx - 1)   # static shift
                    slab = fpad[0:cin, start:start + L]        # (cin, L) window
                    acc = acc + jnp.dot(
                        w_ref[tap].astype(compute_dtype),
                        slab.astype(compute_dtype),
                        preferred_element_type=jnp.float32)
            acc = acc + b_ref[...].astype(jnp.float32)          # bias (G,1) bcast
            acc = jnp.maximum(acc, 0.0)                         # ReLU
            acc = acc * mask                                    # pad pixels -> 0
            fpad[G0 + c * G:G0 + (c + 1) * G, guard:guard + L] = acc.astype(fpad.dtype)

        # ---- LFF (1x1 conv over the full stack) + residual -----------------
        stack = fpad[:, guard:guard + L]                        # (Ctot, L)
        out = jnp.dot(wlff_ref[...].astype(compute_dtype),
                      stack.astype(compute_dtype),
                      preferred_element_type=jnp.float32)       # (G0, L)
        out = out + blff_ref[...].astype(jnp.float32)
        out = out + x_val                                       # residual (pads 0)
        o_ref[0] = out.astype(o_ref.dtype)                      # lane-dense store

    return kernel


# ---------------------------------------------------------------------------
# Wrapper: one pallas_call for the whole RDB
# ---------------------------------------------------------------------------
@jax.jit
def rdb_forward(x, params):
    """RDB forward.  x: (N, G0, H, W) NCHW (same layout as the PyTorch module)."""
    N, G0, H, W = x.shape
    convs = params["convs"]
    C = len(convs)
    G = convs[0][0].shape[-1]
    Ctot = G0 + C * G
    assert params["lff_w"].shape == (Ctot, G0)

    Hp, Wp = H + 2, W + 2
    L = Hp * Wp
    guard = Wp + 1                      # largest |tap shift| is Wp + 1
    LG = L + 2 * guard

    # One-time zero "same" padding of the block input (single tiny XLA op, NOT
    # per layer) and flatten to the lane-dense (N, G0, (H+2)*(W+2)) layout.
    xp = jnp.pad(x, ((0, 0), (0, 0), (1, 1), (1, 1))).reshape(N, G0, L)

    # Interior mask (host constant): keeps pad pixels of freshly written layer
    # channels at exactly zero inside the scratch stack.
    m2 = np.zeros((Hp, Wp), np.float32)
    m2[1:H + 1, 1:W + 1] = 1.0
    mask = jnp.asarray(m2.reshape(1, L))

    flat_inputs = [xp, mask]
    in_specs = [
        pl.BlockSpec((1, G0, L), lambda n: (n, 0, 0)),
        pl.BlockSpec((1, L), lambda n: (0, 0)),
    ]
    weight_bytes = 0
    for (w, b) in convs:
        kh, kw, cin, g = w.shape
        # HWIO (3,3,cin,G) -> (9, G, cin): tap t is a ready-to-use (G,cin) matrix.
        wt = jnp.transpose(w, (0, 1, 3, 2)).reshape(kh * kw, g, cin)
        wt = wt.astype(MXU_INPUT_DTYPE)
        bt = b.reshape(g, 1)
        flat_inputs += [wt, bt]
        in_specs += [
            pl.BlockSpec((kh * kw, g, cin), lambda n: (0, 0, 0)),
            pl.BlockSpec((g, 1), lambda n: (0, 0)),
        ]
        weight_bytes += kh * kw * g * cin * np.dtype(MXU_INPUT_DTYPE).itemsize + g * 4
    wlff = params["lff_w"].T.astype(MXU_INPUT_DTYPE)            # (G0, Ctot)
    blff = params["lff_b"].reshape(G0, 1)
    flat_inputs += [wlff, blff]
    in_specs += [
        pl.BlockSpec((G0, Ctot), lambda n: (0, 0)),
        pl.BlockSpec((G0, 1), lambda n: (0, 0)),
    ]
    weight_bytes += G0 * Ctot * np.dtype(MXU_INPUT_DTYPE).itemsize + G0 * 4

    # VMEM budget from actual footprint (stack + double-buffered I/O blocks +
    # weights + slack) instead of a hard-coded constant; capped at 100 MiB.
    stack_bytes = Ctot * LG * np.dtype(STACK_DTYPE).itemsize
    io_bytes = 2 * 2 * G0 * L * 4
    vmem_limit = int(min(100 << 20,
                         stack_bytes + io_bytes + 2 * weight_bytes + (8 << 20)))

    kernel = _make_rdb_kernel(C=C, G0=G0, G=G, Ctot=Ctot, H=H, W=W,
                              guard=guard, compute_dtype=MXU_INPUT_DTYPE)

    # TODO(synk): for realistic H,W add a row-block grid axis with a 1-row halo
    # so the per-block stack fits v7x's 64 MiB VMEM and both TensorCores get
    # work when N is small; use ~2x larger row blocks on v5e/v6e (128 MiB VMEM).
    out_padded = pl.pallas_call(
        kernel,
        out_shape=jax.ShapeDtypeStruct((N, G0, L), x.dtype),
        grid_spec=pltpu.PrefetchScalarGridSpec(
            num_scalar_prefetch=0,
            grid=(N,),
            in_specs=in_specs,
            out_specs=pl.BlockSpec((1, G0, L), lambda n: (n, 0, 0)),
            scratch_shapes=[pltpu.VMEM((Ctot, LG), STACK_DTYPE)],
        ),
        compiler_params=pltpu.CompilerParams(
            dimension_semantics=("parallel",),
            vmem_limit_bytes=vmem_limit,
        ),
    )(*flat_inputs)

    # Drop the 1-pixel border (the kernel store stays lane-dense; this is a
    # trivial XLA slice on a small array).
    return out_padded.reshape(N, G0, Hp, Wp)[:, :, 1:H + 1, 1:W + 1]


# ---------------------------------------------------------------------------
# Parameter init (HWIO layout) and a pure-JAX reference for verification
# ---------------------------------------------------------------------------
def init_rdb_params(key, G0, G, C, kSize=3):
    params = {"convs": []}
    for c in range(C):
        cin = G0 + c * G
        key, kw, kb = jax.random.split(key, 3)
        fan_in = cin * kSize * kSize
        bound = 1.0 / np.sqrt(fan_in)
        w = jax.random.uniform(kw, (kSize, kSize, cin, G), jnp.float32, -bound, bound)
        b = jax.random.uniform(kb, (G,), jnp.float32, -bound, bound)
        params["convs"].append((w, b))
    ctot = G0 + C * G
    key, kw, kb = jax.random.split(key, 3)
    bound = 1.0 / np.sqrt(ctot)
    params["lff_w"] = jax.random.uniform(kw, (ctot, G0), jnp.float32, -bound, bound)
    params["lff_b"] = jax.random.uniform(kb, (G0,), jnp.float32, -bound, bound)
    return params


def rdb_reference(x_nchw, params):
    x = jnp.transpose(x_nchw, (0, 2, 3, 1))                    # NHWC
    feat = x
    for (w, b) in params["convs"]:
        y = lax.conv_general_dilated(
            feat, w, (1, 1), "SAME",
            dimension_numbers=("NHWC", "HWIO", "NHWC")) + b
        feat = jnp.concatenate([feat, jnp.maximum(y, 0.0)], -1)
    w1 = params["lff_w"][None, None]                            # (1,1,Ctot,G0)
    y = lax.conv_general_dilated(
        feat, w1, (1, 1), "SAME",
        dimension_numbers=("NHWC", "HWIO", "NHWC")) + params["lff_b"]
    y = y + x
    return jnp.transpose(y, (0, 3, 1, 2))                       # back to NCHW


if __name__ == "__main__":
    # RDB(growRate0=4, growRate=4, nConvLayers=3), input (N=2, C=4, H=16, W=16)
    N, G0, G, C, H, W = 2, 4, 4, 3, 16, 16

    key = jax.random.PRNGKey(0)
    kx, kp = jax.random.split(key)
    x = jax.random.normal(kx, (N, G0, H, W), jnp.float32)       # NCHW, like PyTorch
    params = init_rdb_params(kp, G0, G, C)

    out = jax.block_until_ready(rdb_forward(x, params))
    ref = jax.block_until_ready(rdb_reference(x, params))

    np.testing.assert_allclose(np.asarray(out), np.asarray(ref),
                               rtol=1e-3, atol=1e-3)
    assert out.shape == (N, G0, H, W)
    print("KERNEL_OK")
</pallas_src>

<mosaic_0001>
module attributes {stable_mosaic.version = 11 : i64} {
  func.func @kernel(%arg0: i32, %arg1: memref<1x4x324xf32, #tpu.memory_space<vmem>>, %arg2: memref<1x324xf32, #tpu.memory_space<vmem>>, %arg3: memref<9x4x4xf32, #tpu.memory_space<vmem>>, %arg4: memref<4x1xf32, #tpu.memory_space<vmem>>, %arg5: memref<9x4x8xf32, #tpu.memory_space<vmem>>, %arg6: memref<4x1xf32, #tpu.memory_space<vmem>>, %arg7: memref<9x4x12xf32, #tpu.memory_space<vmem>>, %arg8: memref<4x1xf32, #tpu.memory_space<vmem>>, %arg9: memref<4x16xf32, #tpu.memory_space<vmem>>, %arg10: memref<4x1xf32, #tpu.memory_space<vmem>>, %arg11: memref<1x4x324xf32, #tpu.memory_space<vmem>>, %arg12: memref<16x362xf32, #tpu.memory_space<vmem>>) attributes {dimension_semantics = [#tpu.dimension_semantics<parallel>], iteration_bounds = array<i64: 2>, scalar_prefetch = 0 : i64, scratch_operands = 1 : i64, tpu.core_type = #tpu.core_type<tc>, window_params = [{transform_indices = @transform_0, window_bounds = array<i64: 1, 4, 324>}, {pipeline_mode = #tpu.pipeline_mode<synchronous>, transform_indices = @transform_1, window_bounds = array<i64: 1, 324>}, {pipeline_mode = #tpu.pipeline_mode<synchronous>, transform_indices = @transform_2, window_bounds = array<i64: 9, 4, 4>}, {pipeline_mode = #tpu.pipeline_mode<synchronous>, transform_indices = @transform_3, window_bounds = array<i64: 4, 1>}, {pipeline_mode = #tpu.pipeline_mode<synchronous>, transform_indices = @transform_4, window_bounds = array<i64: 9, 4, 8>}, {pipeline_mode = #tpu.pipeline_mode<synchronous>, transform_indices = @transform_5, window_bounds = array<i64: 4, 1>}, {pipeline_mode = #tpu.pipeline_mode<synchronous>, transform_indices = @transform_6, window_bounds = array<i64: 9, 4, 12>}, {pipeline_mode = #tpu.pipeline_mode<synchronous>, transform_indices = @transform_7, window_bounds = array<i64: 4, 1>}, {pipeline_mode = #tpu.pipeline_mode<synchronous>, transform_indices = @transform_8, window_bounds = array<i64: 4, 16>}, {pipeline_mode = #tpu.pipeline_mode<synchronous>, transform_indices = @transform_9, window_bounds = array<i64: 4, 1>}, {transform_indices = @transform_10, window_bounds = array<i64: 1, 4, 324>}]} {
    %cst = arith.constant 0.000000e+00 : f32
    %0 = vector.broadcast %cst : f32 to vector<16x19xf32>
    %c0 = arith.constant 0 : index
    %c0_0 = arith.constant 0 : index
    %1 = vector.load %arg12[%c0, %c0_0] : memref<16x362xf32, #tpu.memory_space<vmem>>, vector<16x19xf32>
    tpu.vector_store %arg12[%c0, %c0_0], %0 {strides = array<i32>} : memref<16x362xf32, #tpu.memory_space<vmem>>, vector<16x19xf32>,
    %cst_1 = arith.constant 0.000000e+00 : f32
    %2 = vector.broadcast %cst_1 : f32 to vector<16x19xf32>
    %c0_2 = arith.constant 0 : index
    %c343 = arith.constant 343 : index
    %3 = vector.load %arg12[%c0_2, %c343] : memref<16x362xf32, #tpu.memory_space<vmem>>, vector<16x19xf32>
    tpu.vector_store %arg12[%c0_2, %c343], %2 {strides = array<i32>} : memref<16x362xf32, #tpu.memory_space<vmem>>, vector<16x19xf32>,
    %c0_3 = arith.constant 0 : index
    %c0_4 = arith.constant 0 : index
    %c0_5 = arith.constant 0 : index
    %4 = vector.load %arg1[%c0_3, %c0_4, %c0_5] : memref<1x4x324xf32, #tpu.memory_space<vmem>>, vector<1x4x324xf32>
    %5 = vector.shape_cast %4 : vector<1x4x324xf32> to vector<4x324xf32>
    %c0_6 = arith.constant 0 : index
    %c19 = arith.constant 19 : index
    %6 = vector.load %arg12[%c0_6, %c19] : memref<16x362xf32, #tpu.memory_space<vmem>>, vector<4x324xf32>
    tpu.vector_store %arg12[%c0_6, %c19], %5 {strides = array<i32>} : memref<16x362xf32, #tpu.memory_space<vmem>>, vector<4x324xf32>,
    %c0_7 = arith.constant 0 : index
    %c0_8 = arith.constant 0 : index
    %7 = vector.load %arg2[%c0_7, %c0_8] : memref<1x324xf32, #tpu.memory_space<vmem>>, vector<1x324xf32>
    %cst_9 = arith.constant 0.000000e+00 : f32
    %8 = vector.broadcast %cst_9 : f32 to vector<4x324xf32>
    %c0_10 = arith.constant 0 : index
    %c0_11 = arith.constant 0 : index
    %9 = vector.load %arg12[%c0_10, %c0_11] : memref<16x362xf32, #tpu.memory_space<vmem>>, vector<4x324xf32>
    %c0_12 = arith.constant 0 : index
    %c0_13 = arith.constant 0 : index
    %c0_14 = arith.constant 0 : index
    %10 = vector.load %arg3[%c0_12, %c0_13, %c0_14] : memref<9x4x4xf32, #tpu.memory_space<vmem>>, vector<1x4x4xf32>
    %11 = vector.shape_cast %10 : vector<1x4x4xf32> to vector<4x4xf32>
    %cst_15 = arith.constant dense<0.000000e+00> : vector<4x324xf32>
    %12 = tpu.matmul %11, %9, %cst_15 {dimension_numbers = #tpu.dot_dimension_numbers<[1], [0], [0], [1], [0, 0, 1, 1], [], []>} : vector<4x4xf32>, vector<4x324xf32>, vector<4x324xf32> -> vector<4x324xf32>
    %13 = arith.addf %8, %12 : vector<4x324xf32>
    %c0_16 = arith.constant 0 : index
    %c1 = arith.constant 1 : index
    %14 = vector.load %arg12[%c0_16, %c1] : memref<16x362xf32, #tpu.memory_space<vmem>>, vector<4x324xf32>
    %c1_17 = arith.constant 1 : index
    %c0_18 = arith.constant 0 : index
    %c0_19 = arith.constant 0 : index
    %15 = vector.load %arg3[%c1_17, %c0_18, %c0_19] : memref<9x4x4xf32, #tpu.memory_space<vmem>>, vector<1x4x4xf32>
    %16 = vector.shape_cast %15 : vector<1x4x4xf32> to vector<4x4xf32>
    %cst_20 = arith.constant dense<0.000000e+00> : vector<4x324xf32>
    %17 = tpu.matmul %16, %14, %cst_20 {dimension_numbers = #tpu.dot_dimension_numbers<[1], [0], [0], [1], [0, 0, 1, 1], [], []>} : vector<4x4xf32>, vector<4x324xf32>, vector<4x324xf32> -> vector<4x324xf32>
    %18 = arith.addf %13, %17 : vector<4x324xf32>
    %c0_21 = arith.constant 0 : index
    %c2 = arith.constant 2 : index
    %19 = vector.load %arg12[%c0_21, %c2] : memref<16x362xf32, #tpu.memory_space<vmem>>, vector<4x324xf32>
    %c2_22 = arith.constant 2 : index
    %c0_23 = arith.constant 0 : index
    %c0_24 = arith.constant 0 : index
    %20 = vector.load %arg3[%c2_22, %c0_23, %c0_24] : memref<9x4x4xf32, #tpu.memory_space<vmem>>, vector<1x4x4xf32>
    %21 = vector.shape_cast %20 : vector<1x4x4xf32> to vector<4x4xf32>
    %cst_25 = arith.constant dense<0.000000e+00> : vector<4x324xf32>
    %22 = tpu.matmul %21, %19, %cst_25 {dimension_numbers = #tpu.dot_dimension_numbers<[1], [0], [0], [1], [0, 0, 1, 1], [], []>} : vector<4x4xf32>, vector<4x324xf32>, vector<4x324xf32> -> vector<4x324xf32>
    %23 = arith.addf %18, %22 : vector<4x324xf32>
    %c0_26 = arith.constant 0 : index
    %c18 = arith.constant 18 : index
    %24 = vector.load %arg12[%c0_26, %c18] : memref<16x362xf32, #tpu.memory_space<vmem>>, vector<4x324xf32>
    %c3 = arith.constant 3 : index
    %c0_27 = arith.constant 0 : index
    %c0_28 = arith.constant 0 : index
    %25 = vector.load %arg3[%c3, %c0_27, %c0_28] : memref<9x4x4xf32, #tpu.memory_space<vmem>>, vector<1x4x4xf32>
    %26 = vector.shape_cast %25 : vector<1x4x4xf32> to vector<4x4xf32>
    %cst_29 = arith.constant dense<0.000000e+00> : vector<4x324xf32>
    %27 = tpu.matmul %26, %24, %cst_29 {dimension_numbers = #tpu.dot_dimension_numbers<[1], [0], [0], [1], [0, 0, 1, 1], [], []>} : vector<4x4xf32>, vector<4x324xf32>, vector<4x324xf32> -> vector<4x324xf32>
    %28 = arith.addf %23, %27 : vector<4x324xf32>
    %c0_30 = arith.constant 0 : index
    %c19_31 = arith.constant 19 : index
    %29 = vector.load %arg12[%c0_30, %c19_31] : memref<16x362xf32, #tpu.memory_space<vmem>>, vector<4x324xf32>
    %c4 = arith.constant 4 : index
    %c0_32 = arith.constant 0 : index
    %c0_33 = arith.constant 0 : index
    %30 = vector.load %arg3[%c4, %c0_32, %c0_33] : memref<9x4x4xf32, #tpu.memory_space<vmem>>, vector<1x4x4xf32>
    %31 = vector.shape_cast %30 : vector<1x4x4xf32> to vector<4x4xf32>
    %cst_34 = arith.constant dense<0.000000e+00> : vector<4x324xf32>
    %32 = tpu.matmul %31, %29, %cst_34 {dimension_numbers = #tpu.dot_dimension_numbers<[1], [0], [0], [1], [0, 0, 1, 1], [], []>} : vector<4x4xf32>, vector<4x324xf32>, vector<4x324xf32> -> vector<4x324xf32>
    %33 = arith.addf %28, %32 : vector<4x324xf32>
    %c0_35 = arith.constant 0 : index
    %c20 = arith.constant 20 : index
    %34 = vector.load %arg12[%c0_35, %c20] : memref<16x362xf32, #tpu.memory_space<vmem>>, vector<4x324xf32>
    %c5 = arith.constant 5 : index
    %c0_36 = arith.constant 0 : index
    %c0_37 = arith.constant 0 : index
    %35 = vector.load %arg3[%c5, %c0_36, %c0_37] : memref<9x4x4xf32, #tpu.memory_space<vmem>>, vector<1x4x4xf32>
    %36 = vector.shape_cast %35 : vector<1x4x4xf32> to vector<4x4xf32>
    %cst_38 = arith.constant dense<0.000000e+00> : vector<4x324xf32>
    %37 = tpu.matmul %36, %34, %cst_38 {dimension_numbers = #tpu.dot_dimension_numbers<[1], [0], [0], [1], [0, 0, 1, 1], [], []>} : vector<4x4xf32>, vector<4x324xf32>, vector<4x324xf32> -> vector<4x324xf32>
    %38 = arith.addf %33, %37 : vector<4x324xf32>
    %c0_39 = arith.constant 0 : index
    %c36 = arith.constant 36 : index
    %39 = vector.load %arg12[%c0_39, %c36] : memref<16x362xf32, #tpu.memory_space<vmem>>, vector<4x324xf32>
    %c6 = arith.constant 6 : index
    %c0_40 = arith.constant 0 : index
    %c0_41 = arith.constant 0 : index
    %40 = vector.load %arg3[%c6, %c0_40, %c0_41] : memref<9x4x4xf32, #tpu.memory_space<vmem>>, vector<1x4x4xf32>
    %41 = vector.shape_cast %40 : vector<1x4x4xf32> to vector<4x4xf32>
    %cst_42 = arith.constant dense<0.000000e+00> : vector<4x324xf32>
    %42 = tpu.matmul %41, %39, %cst_42 {dimension_numbers = #tpu.dot_dimension_numbers<[1], [0], [0], [1], [0, 0, 1, 1], [], []>} : vector<4x4xf32>, vector<4x324xf32>, vector<4x324xf32> -> vector<4x324xf32>
    %43 = arith.addf %38, %42 : vector<4x324xf32>
    %c0_43 = arith.constant 0 : index
    %c37 = arith.constant 37 : index
    %44 = vector.load %arg12[%c0_43, %c37] : memref<16x362xf32, #tpu.memory_space<vmem>>, vector<4x324xf32>
    %c7 = arith.constant 7 : index
    %c0_44 = arith.constant 0 : index
    %c0_45 = arith.constant 0 : index
    %45 = vector.load %arg3[%c7, %c0_44, %c0_45] : memref<9x4x4xf32, #tpu.memory_space<vmem>>, vector<1x4x4xf32>
    %46 = vector.shape_cast %45 : vector<1x4x4xf32> to vector<4x4xf32>
    %cst_46 = arith.constant dense<0.000000e+00> : vector<4x324xf32>
    %47 = tpu.matmul %46, %44, %cst_46 {dimension_numbers = #tpu.dot_dimension_numbers<[1], [0], [0], [1], [0, 0, 1, 1], [], []>} : vector<4x4xf32>, vector<4x324xf32>, vector<4x324xf32> -> vector<4x324xf32>
    %48 = arith.addf %43, %47 : vector<4x324xf32>
    %c0_47 = arith.constant 0 : index
    %c38 = arith.constant 38 : index
    %49 = vector.load %arg12[%c0_47, %c38] : memref<16x362xf32, #tpu.memory_space<vmem>>, vector<4x324xf32>
    %c8 = arith.constant 8 : index
    %c0_48 = arith.constant 0 : index
    %c0_49 = arith.constant 0 : index
    %50 = vector.load %arg3[%c8, %c0_48, %c0_49] : memref<9x4x4xf32, #tpu.memory_space<vmem>>, vector<1x4x4xf32>
    %51 = vector.shape_cast %50 : vector<1x4x4xf32> to vector<4x4xf32>
    %cst_50 = arith.constant dense<0.000000e+00> : vector<4x324xf32>
    %52 = tpu.matmul %51, %49, %cst_50 {dimension_numbers = #tpu.dot_dimension_numbers<[1], [0], [0], [1], [0, 0, 1, 1], [], []>} : vector<4x4xf32>, vector<4x324xf32>, vector<4x324xf32> -> vector<4x324xf32>
    %53 = arith.addf %48, %52 : vector<4x324xf32>
    %c0_51 = arith.constant 0 : index
    %c0_52 = arith.constant 0 : index
    %54 = vector.load %arg4[%c0_51, %c0_52] : memref<4x1xf32, #tpu.memory_space<vmem>>, vector<4x1xf32>
    %55 = vector.broadcast %54 : vector<4x1xf32> to vector<4x324xf32>
    %56 = arith.addf %53, %55 : vector<4x324xf32>
    %cst_53 = arith.constant 0.000000e+00 : f32
    %57 = vector.broadcast %cst_53 : f32 to vector<4x324xf32>
    %58 = arith.maximumf %56, %57 : vector<4x324xf32>
    %59 = vector.broadcast %7 : vector<1x324xf32> to vector<4x324xf32>
    %60 = arith.mulf %58, %59 : vector<4x324xf32>
    %c4_54 = arith.constant 4 : index
    %c19_55 = arith.constant 19 : index
    %61 = vector.load %arg12[%c4_54, %c19_55] : memref<16x362xf32, #tpu.memory_space<vmem>>, vector<4x324xf32>
    tpu.vector_store %arg12[%c4_54, %c19_55], %60 {strides = array<i32>} : memref<16x362xf32, #tpu.memory_space<vmem>>, vector<4x324xf32>,
    %cst_56 = arith.constant 0.000000e+00 : f32
    %62 = vector.broadcast %cst_56 : f32 to vector<4x324xf32>
    %c0_57 = arith.constant 0 : index
    %c0_58 = arith.constant 0 : index
    %63 = vector.load %arg12[%c0_57, %c0_58] : memref<16x362xf32, #tpu.memory_space<vmem>>, vector<8x324xf32>
    %c0_59 = arith.constant 0 : index
    %c0_60 = arith.constant 0 : index
    %c0_61 = arith.constant 0 : index
    %64 = vector.load %arg5[%c0_59, %c0_60, %c0_61] : memref<9x4x8xf32, #tpu.memory_space<vmem>>, vector<1x4x8xf32>
    %65 = vector.shape_cast %64 : vector<1x4x8xf32> to vector<4x8xf32>
    %cst_62 = arith.constant dense<0.000000e+00> : vector<4x324xf32>
    %66 = tpu.matmul %65, %63, %cst_62 {dimension_numbers = #tpu.dot_dimension_numbers<[1], [0], [0], [1], [0, 0, 1, 1], [], []>} : vector<4x8xf32>, vector<8x324xf32>, vector<4x324xf32> -> vector<4x324xf32>
    %67 = arith.addf %62, %66 : vector<4x324xf32>
    %c0_63 = arith.constant 0 : index
    %c1_64 = arith.constant 1 : index
    %68 = vector.load %arg12[%c0_63, %c1_64] : memref<16x362xf32, #tpu.memory_space<vmem>>, vector<8x324xf32>
    %c1_65 = arith.constant 1 : index
    %c0_66 = arith.constant 0 : index
    %c0_67 = arith.constant 0 : index
    %69 = vector.load %arg5[%c1_65, %c0_66, %c0_67] : memref<9x4x8xf32, #tpu.memory_space<vmem>>, vector<1x4x8xf32>
    %70 = vector.shape_cast %69 : vector<1x4x8xf32> to vector<4x8xf32>
    %cst_68 = arith.constant dense<0.000000e+00> : vector<4x324xf32>
    %71 = tpu.matmul %70, %68, %cst_68 {dimension_numbers = #tpu.dot_dimension_numbers<[1], [0], [0], [1], [0, 0, 1, 1], [], []>} : vector<4x8xf32>, vector<8x324xf32>, vector<4x324xf32> -> vector<4x324xf32>
    %72 = arith.addf %67, %71 : vector<4x324xf32>
    %c0_69 = arith.constant 0 : index
    %c2_70 = arith.constant 2 : index
    %73 = vector.load %arg12[%c0_69, %c2_70] : memref<16x362xf32, #tpu.memory_space<vmem>>, vector<8x324xf32>
    %c2_71 = arith.constant 2 : index
    %c0_72 = arith.constant 0 : index
    %c0_73 = arith.constant 0 : index
    %74 = vector.load %arg5[%c2_71, %c0_72, %c0_73] : memref<9x4x8xf32, #tpu.memory_space<vmem>>, vector<1x4x8xf32>
    %75 = vector.shape_cast %74 : vector<1x4x8xf32> to vector<4x8xf32>
    %cst_74 = arith.constant dense<0.000000e+00> : vector<4x324xf32>
    %76 = tpu.matmul %75, %73, %cst_74 {dimension_numbers = #tpu.dot_dimension_numbers<[1], [0], [0], [1], [0, 0, 1, 1], [], []>} : vector<4x8xf32>, vector<8x324xf32>, vector<4x324xf32> -> vector<4x324xf32>
    %77 = arith.addf %72, %76 : vector<4x324xf32>
    %c0_75 = arith.constant 0 : index
    %c18_76 = arith.constant 18 : index
    %78 = vector.load %arg12[%c0_75, %c18_76] : memref<16x362xf32, #tpu.memory_space<vmem>>, vector<8x324xf32>
    %c3_77 = arith.constant 3 : index
    %c0_78 = arith.constant 0 : index
    %c0_79 = arith.constant 0 : index
    %79 = vector.load %arg5[%c3_77, %c0_78, %c0_79] : memref<9x4x8xf32, #tpu.memory_space<vmem>>, vector<1x4x8xf32>
    %80 = vector.shape_cast %79 : vector<1x4x8xf32> to vector<4x8xf32>
    %cst_80 = arith.constant dense<0.000000e+00> : vector<4x324xf32>
    %81 = tpu.matmul %80, %78, %cst_80 {dimension_numbers = #tpu.dot_dimension_numbers<[1], [0], [0], [1], [0, 0, 1, 1], [], []>} : vector<4x8xf32>, vector<8x324xf32>, vector<4x324xf32> -> vector<4x324xf32>
    %82 = arith.addf %77, %81 : vector<4x324xf32>
    %c0_81 = arith.constant 0 : index
    %c19_82 = arith.constant 19 : index
    %83 = vector.load %arg12[%c0_81, %c19_82] : memref<16x362xf32, #tpu.memory_space<vmem>>, vector<8x324xf32>
    %c4_83 = arith.constant 4 : index
    %c0_84 = arith.constant 0 : index
    %c0_85 = arith.constant 0 : index
    %84 = vector.load %arg5[%c4_83, %c0_84, %c0_85] : memref<9x4x8xf32, #tpu.memory_space<vmem>>, vector<1x4x8xf32>
    %85 = vector.shape_cast %84 : vector<1x4x8xf32> to vector<4x8xf32>
    %cst_86 = arith.constant dense<0.000000e+00> : vector<4x324xf32>
    %86 = tpu.matmul %85, %83, %cst_86 {dimension_numbers = #tpu.dot_dimension_numbers<[1], [0], [0], [1], [0, 0, 1, 1], [], []>} : vector<4x8xf32>, vector<8x324xf32>, vector<4x324xf32> -> vector<4x324xf32>
    %87 = arith.addf %82, %86 : vector<4x324xf32>
    %c0_87 = arith.constant 0 : index
    %c20_88 = arith.constant 20 : index
    %88 = vector.load %arg12[%c0_87, %c20_88] : memref<16x362xf32, #tpu.memory_space<vmem>>, vector<8x324xf32>
    %c5_89 = arith.constant 5 : index
    %c0_90 = arith.constant 0 : index
    %c0_91 = arith.constant 0 : index
    %89 = vector.load %arg5[%c5_89, %c0_90, %c0_91] : memref<9x4x8xf32, #tpu.memory_space<vmem>>, vector<1x4x8xf32>
    %90 = vector.shape_cast %89 : vector<1x4x8xf32> to vector<4x8xf32>
    %cst_92 = arith.constant dense<0.000000e+00> : vector<4x324xf32>
    %91 = tpu.matmul %90, %88, %cst_92 {dimension_numbers = #tpu.dot_dimension_numbers<[1], [0], [0], [1], [0, 0, 1, 1], [], []>} : vector<4x8xf32>, vector<8x324xf32>, vector<4x324xf32> -> vector<4x324xf32>
    %92 = arith.addf %87, %91 : vector<4x324xf32>
    %c0_93 = arith.constant 0 : index
    %c36_94 = arith.constant 36 : index
    %93 = vector.load %arg12[%c0_93, %c36_94] : memref<16x362xf32, #tpu.memory_space<vmem>>, vector<8x324xf32>
    %c6_95 = arith.constant 6 : index
    %c0_96 = arith.constant 0 : index
    %c0_97 = arith.constant 0 : index
    %94 = vector.load %arg5[%c6_95, %c0_96, %c0_97] : memref<9x4x8xf32, #tpu.memory_space<vmem>>, vector<1x4x8xf32>
    %95 = vector.shape_cast %94 : vector<1x4x8xf32> to vector<4x8xf32>
    %cst_98 = arith.constant dense<0.000000e+00> : vector<4x324xf32>
    %96 = tpu.matmul %95, %93, %cst_98 {dimension_numbers = #tpu.dot_dimension_numbers<[1], [0], [0], [1], [0, 0, 1, 1], [], []>} : vector<4x8xf32>, vector<8x324xf32>, vector<4x324xf32> -> vector<4x324xf32>
    %97 = arith.addf %92, %96 : vector<4x324xf32>
    %c0_99 = arith.constant 0 : index
    %c37_100 = arith.constant 37 : index
    %98 = vector.load %arg12[%c0_99, %c37_100] : memref<16x362xf32, #tpu.memory_space<vmem>>, vector<8x324xf32>
    %c7_101 = arith.constant 7 : index
    %c0_102 = arith.constant 0 : index
    %c0_103 = arith.constant 0 : index
    %99 = vector.load %arg5[%c7_101, %c0_102, %c0_103] : memref<9x4x8xf32, #tpu.memory_space<vmem>>, vector<1x4x8xf32>
    %100 = vector.shape_cast %99 : vector<1x4x8xf32> to vector<4x8xf32>
    %cst_104 = arith.constant dense<0.000000e+00> : vector<4x324xf32>
    %101 = tpu.matmul %100, %98, %cst_104 {dimension_numbers = #tpu.dot_dimension_numbers<[1], [0], [0], [1], [0, 0, 1, 1], [], []>} : vector<4x8xf32>, vector<8x324xf32>, vector<4x324xf32> -> vector<4x324xf32>
    %102 = arith.addf %97, %101 : vector<4x324xf32>
    %c0_105 = arith.constant 0 : index
    %c38_106 = arith.constant 38 : index
    %103 = vector.load %arg12[%c0_105, %c38_106] : memref<16x362xf32, #tpu.memory_space<vmem>>, vector<8x324xf32>
    %c8_107 = arith.constant 8 : index
    %c0_108 = arith.constant 0 : index
    %c0_109 = arith.constant 0 : index
    %104 = vector.load %arg5[%c8_107, %c0_108, %c0_109] : memref<9x4x8xf32, #tpu.memory_space<vmem>>, vector<1x4x8xf32>
    %105 = vector.shape_cast %104 : vector<1x4x8xf32> to vector<4x8xf32>
    %cst_110 = arith.constant dense<0.000000e+00> : vector<4x324xf32>
    %106 = tpu.matmul %105, %103, %cst_110 {dimension_numbers = #tpu.dot_dimension_numbers<[1], [0], [0], [1], [0, 0, 1, 1], [], []>} : vector<4x8xf32>, vector<8x324xf32>, vector<4x324xf32> -> vector<4x324xf32>
    %107 = arith.addf %102, %106 : vector<4x324xf32>
    %c0_111 = arith.constant 0 : index
    %c0_112 = arith.constant 0 : index
    %108 = vector.load %arg6[%c0_111, %c0_112] : memref<4x1xf32, #tpu.memory_space<vmem>>, vector<4x1xf32>
    %109 = vector.broadcast %108 : vector<4x1xf32> to vector<4x324xf32>
    %110 = arith.addf %107, %109 : vector<4x324xf32>
    %cst_113 = arith.constant 0.000000e+00 : f32
    %111 = vector.broadcast %cst_113 : f32 to vector<4x324xf32>
    %112 = arith.maximumf %110, %111 : vector<4x324xf32>
    %113 = vector.broadcast %7 : vector<1x324xf32> to vector<4x324xf32>
    %114 = arith.mulf %112, %113 : vector<4x324xf32>
    %c8_114 = arith.constant 8 : index
    %c19_115 = arith.constant 19 : index
    %115 = vector.load %arg12[%c8_114, %c19_115] : memref<16x362xf32, #tpu.memory_space<vmem>>, vector<4x324xf32>
    tpu.vector_store %arg12[%c8_114, %c19_115], %114 {strides = array<i32>} : memref<16x362xf32, #tpu.memory_space<vmem>>, vector<4x324xf32>,
    %cst_116 = arith.constant 0.000000e+00 : f32
    %116 = vector.broadcast %cst_116 : f32 to vector<4x324xf32>
    %c0_117 = arith.constant 0 : index
    %c0_118 = arith.constant 0 : index
    %117 = vector.load %arg12[%c0_117, %c0_118] : memref<16x362xf32, #tpu.memory_space<vmem>>, vector<12x324xf32>
    %c0_119 = arith.constant 0 : index
    %c0_120 = arith.constant 0 : index
    %c0_121 = arith.constant 0 : index
    %118 = vector.load %arg7[%c0_119, %c0_120, %c0_121] : memref<9x4x12xf32, #tpu.memory_space<vmem>>, vector<1x4x12xf32>
    %119 = vector.shape_cast %118 : vector<1x4x12xf32> to vector<4x12xf32>
    %cst_122 = arith.constant dense<0.000000e+00> : vector<4x324xf32>
    %120 = tpu.matmul %119, %117, %cst_122 {dimension_numbers = #tpu.dot_dimension_numbers<[1], [0], [0], [1], [0, 0, 1, 1], [], []>} : vector<4x12xf32>, vector<12x324xf32>, vector<4x324xf32> -> vector<4x324xf32>
    %121 = arith.addf %116, %120 : vector<4x324xf32>
    %c0_123 = arith.constant 0 : index
    %c1_124 = arith.constant 1 : index
    %122 = vector.load %arg12[%c0_123, %c1_124] : memref<16x362xf32, #tpu.memory_space<vmem>>, vector<12x324xf32>
    %c1_125 = arith.constant 1 : index
    %c0_126 = arith.constant 0 : index
    %c0_127 = arith.constant 0 : index
    %123 = vector.load %arg7[%c1_125, %c0_126, %c0_127] : memref<9x4x12xf32, #tpu.memory_space<vmem>>, vector<1x4x12xf32>
    %124 = vector.shape_cast %123 : vector<1x4x12xf32> to vector<4x12xf32>
    %cst_128 = arith.constant dense<0.000000e+00> : vector<4x324xf32>
    %125 = tpu.matmul %124, %122, %cst_128 {dimension_numbers = #tpu.dot_dimension_numbers<[1], [0], [0], [1], [0, 0, 1, 1], [], []>} : vector<4x12xf32>, vector<12x324xf32>, vector<4x324xf32> -> vector<4x324xf32>
    %126 = arith.addf %121, %125 : vector<4x324xf32>
    %c0_129 = arith.constant 0 : index
    %c2_130 = arith.constant 2 : index
    %127 = vector.load %arg12[%c0_129, %c2_130] : memref<16x362xf32, #tpu.memory_space<vmem>>, vector<12x324xf32>
    %c2_131 = arith.constant 2 : index
    %c0_132 = arith.constant 0 : index
    %c0_133 = arith.constant 0 : index
    %128 = vector.load %arg7[%c2_131, %c0_132, %c0_133] : memref<9x4x12xf32, #tpu.memory_space<vmem>>, vector<1x4x12xf32>
    %129 = vector.shape_cast %128 : vector<1x4x12xf32> to vector<4x12xf32>
    %cst_134 = arith.constant dense<0.000000e+00> : vector<4x324xf32>
    %130 = tpu.matmul %129, %127, %cst_134 {dimension_numbers = #tpu.dot_dimension_numbers<[1], [0], [0], [1], [0, 0, 1, 1], [], []>} : vector<4x12xf32>, vector<12x324xf32>, vector<4x324xf32> -> vector<4x324xf32>
    %131 = arith.addf %126, %130 : vector<4x324xf32>
    %c0_135 = arith.constant 0 : index
    %c18_136 = arith.constant 18 : index
    %132 = vector.load %arg12[%c0_135, %c18_136] : memref<16x362xf32, #tpu.memory_space<vmem>>, vector<12x324xf32>
    %c3_137 = arith.constant 3 : index
    %c0_138 = arith.constant 0 : index
    %c0_139 = arith.constant 0 : index
    %133 = vector.load %arg7[%c3_137, %c0_138, %c0_139] : memref<9x4x12xf32, #tpu.memory_space<vmem>>, vector<1x4x12xf32>
    %134 = vector.shape_cast %133 : vector<1x4x12xf32> to vector<4x12xf32>
    %cst_140 = arith.constant dense<0.000000e+00> : vector<4x324xf32>
    %135 = tpu.matmul %134, %132, %cst_140 {dimension_numbers = #tpu.dot_dimension_numbers<[1], [0], [0], [1], [0, 0, 1, 1], [], []>} : vector<4x12xf32>, vector<12x324xf32>, vector<4x324xf32> -> vector<4x324xf32>
    %136 = arith.addf %131, %135 : vector<4x324xf32>
    %c0_141 = arith.constant 0 : index
    %c19_142 = arith.constant 19 : index
    %137 = vector.load %arg12[%c0_141, %c19_142] : memref<16x362xf32, #tpu.memory_space<vmem>>, vector<12x324xf32>
    %c4_143 = arith.constant 4 : index
    %c0_144 = arith.constant 0 : index
    %c0_145 = arith.constant 0 : index
    %138 = vector.load %arg7[%c4_143, %c0_144, %c0_145] : memref<9x4x12xf32, #tpu.memory_space<vmem>>, vector<1x4x12xf32>
    %139 = vector.shape_cast %138 : vector<1x4x12xf32> to vector<4x12xf32>
    %cst_146 = arith.constant dense<0.000000e+00> : vector<4x324xf32>
    %140 = tpu.matmul %139, %137, %cst_146 {dimension_numbers = #tpu.dot_dimension_numbers<[1], [0], [0], [1], [0, 0, 1, 1], [], []>} : vector<4x12xf32>, vector<12x324xf32>, vector<4x324xf32> -> vector<4x324xf32>
    %141 = arith.addf %136, %140 : vector<4x324xf32>
    %c0_147 = arith.constant 0 : index
    %c20_148 = arith.constant 20 : index
    %142 = vector.load %arg12[%c0_147, %c20_148] : memref<16x362xf32, #tpu.memory_space<vmem>>, vector<12x324xf32>
    %c5_149 = arith.constant 5 : index
    %c0_150 = arith.constant 0 : index
    %c0_151 = arith.constant 0 : index
    %143 = vector.load %arg7[%c5_149, %c0_150, %c0_151] : memref<9x4x12xf32, #tpu.memory_space<vmem>>, vector<1x4x12xf32>
    %144 = vector.shape_cast %143 : vector<1x4x12xf32> to vector<4x12xf32>
    %cst_152 = arith.constant dense<0.000000e+00> : vector<4x324xf32>
    %145 = tpu.matmul %144, %142, %cst_152 {dimension_numbers = #tpu.dot_dimension_numbers<[1], [0], [0], [1], [0, 0, 1, 1], [], []>} : vector<4x12xf32>, vector<12x324xf32>, vector<4x324xf32> -> vector<4x324xf32>
    %146 = arith.addf %141, %145 : vector<4x324xf32>
    %c0_153 = arith.constant 0 : index
    %c36_154 = arith.constant 36 : index
    %147 = vector.load %arg12[%c0_153, %c36_154] : memref<16x362xf32, #tpu.memory_space<vmem>>, vector<12x324xf32>
    %c6_155 = arith.constant 6 : index
    %c0_156 = arith.constant 0 : index
    %c0_157 = arith.constant 0 : index
    %148 = vector.load %arg7[%c6_155, %c0_156, %c0_157] : memref<9x4x12xf32, #tpu.memory_space<vmem>>, vector<1x4x12xf32>
    %149 = vector.shape_cast %148 : vector<1x4x12xf32> to vector<4x12xf32>
    %cst_158 = arith.constant dense<0.000000e+00> : vector<4x324xf32>
    %150 = tpu.matmul %149, %147, %cst_158 {dimension_numbers = #tpu.dot_dimension_numbers<[1], [0], [0], [1], [0, 0, 1, 1], [], []>} : vector<4x12xf32>, vector<12x324xf32>, vector<4x324xf32> -> vector<4x324xf32>
    %151 = arith.addf %146, %150 : vector<4x324xf32>
    %c0_159 = arith.constant 0 : index
    %c37_160 = arith.constant 37 : index
    %152 = vector.load %arg12[%c0_159, %c37_160] : memref<16x362xf32, #tpu.memory_space<vmem>>, vector<12x324xf32>
    %c7_161 = arith.constant 7 : index
    %c0_162 = arith.constant 0 : index
    %c0_163 = arith.constant 0 : index
    %153 = vector.load %arg7[%c7_161, %c0_162, %c0_163] : memref<9x4x12xf32, #tpu.memory_space<vmem>>, vector<1x4x12xf32>
    %154 = vector.shape_cast %153 : vector<1x4x12xf32> to vector<4x12xf32>
    %cst_164 = arith.constant dense<0.000000e+00> : vector<4x324xf32>
    %155 = tpu.matmul %154, %152, %cst_164 {dimension_numbers = #tpu.dot_dimension_numbers<[1], [0], [0], [1], [0, 0, 1, 1], [], []>} : vector<4x12xf32>, vector<12x324xf32>, vector<4x324xf32> -> vector<4x324xf32>
    %156 = arith.addf %151, %155 : vector<4x324xf32>
    %c0_165 = arith.constant 0 : index
    %c38_166 = arith.constant 38 : index
    %157 = vector.load %arg12[%c0_165, %c38_166] : memref<16x362xf32, #tpu.memory_space<vmem>>, vector<12x324xf32>
    %c8_167 = arith.constant 8 : index
    %c0_168 = arith.constant 0 : index
    %c0_169 = arith.constant 0 : index
    %158 = vector.load %arg7[%c8_167, %c0_168, %c0_169] : memref<9x4x12xf32, #tpu.memory_space<vmem>>, vector<1x4x12xf32>
    %159 = vector.shape_cast %158 : vector<1x4x12xf32> to vector<4x12xf32>
    %cst_170 = arith.constant dense<0.000000e+00> : vector<4x324xf32>
    %160 = tpu.matmul %159, %157, %cst_170 {dimension_numbers = #tpu.dot_dimension_numbers<[1], [0], [0], [1], [0, 0, 1, 1], [], []>} : vector<4x12xf32>, vector<12x324xf32>, vector<4x324xf32> -> vector<4x324xf32>
    %161 = arith.addf %156, %160 : vector<4x324xf32>
    %c0_171 = arith.constant 0 : index
    %c0_172 = arith.constant 0 : index
    %162 = vector.load %arg8[%c0_171, %c0_172] : memref<4x1xf32, #tpu.memory_space<vmem>>, vector<4x1xf32>
    %163 = vector.broadcast %162 : vector<4x1xf32> to vector<4x324xf32>
    %164 = arith.addf %161, %163 : vector<4x324xf32>
    %cst_173 = arith.constant 0.000000e+00 : f32
    %165 = vector.broadcast %cst_173 : f32 to vector<4x324xf32>
    %166 = arith.maximumf %164, %165 : vector<4x324xf32>
    %167 = vector.broadcast %7 : vector<1x324xf32> to vector<4x324xf32>
    %168 = arith.mulf %166, %167 : vector<4x324xf32>
    %c12 = arith.constant 12 : index
    %c19_174 = arith.constant 19 : index
    %169 = vector.load %arg12[%c12, %c19_174] : memref<16x362xf32, #tpu.memory_space<vmem>>, vector<4x324xf32>
    tpu.vector_store %arg12[%c12, %c19_174], %168 {strides = array<i32>} : memref<16x362xf32, #tpu.memory_space<vmem>>, vector<4x324xf32>,
    %c0_175 = arith.constant 0 : index
    %c19_176 = arith.constant 19 : index
    %170 = vector.load %arg12[%c0_175, %c19_176] : memref<16x362xf32, #tpu.memory_space<vmem>>, vector<16x324xf32>
    %c0_177 = arith.constant 0 : index
    %c0_178 = arith.constant 0 : index
    %171 = vector.load %arg9[%c0_177, %c0_178] : memref<4x16xf32, #tpu.memory_space<vmem>>, vector<4x16xf32>
    %cst_179 = arith.constant dense<0.000000e+00> : vector<4x324xf32>
    %172 = tpu.matmul %171, %170, %cst_179 {dimension_numbers = #tpu.dot_dimension_numbers<[1], [0], [0], [1], [0, 0, 1, 1], [], []>} : vector<4x16xf32>, vector<16x324xf32>, vector<4x324xf32> -> vector<4x324xf32>
    %c0_180 = arith.constant 0 : index
    %c0_181 = arith.constant 0 : index
    %173 = vector.load %arg10[%c0_180, %c0_181] : memref<4x1xf32, #tpu.memory_space<vmem>>, vector<4x1xf32>
    %174 = vector.broadcast %173 : vector<4x1xf32> to vector<4x324xf32>
    %175 = arith.addf %172, %174 : vector<4x324xf32>
    %176 = arith.addf %175, %5 : vector<4x324xf32>
    %c0_182 = arith.constant 0 : index
    %c0_183 = arith.constant 0 : index
    %c0_184 = arith.constant 0 : index
    %177 = vector.load %arg11[%c0_182, %c0_183, %c0_184] : memref<1x4x324xf32, #tpu.memory_space<vmem>>, vector<1x4x324xf32>
    %178 = vector.shape_cast %177 : vector<1x4x324xf32> to vector<4x324xf32>
    %179 = vector.shape_cast %176 : vector<4x324xf32> to vector<1x4x324xf32>
    tpu.vector_store %arg11[%c0_182, %c0_183, %c0_184], %179 {strides = array<i32>} : memref<1x4x324xf32, #tpu.memory_space<vmem>>, vector<1x4x324xf32>,
    return
  }
  func.func @transform_0(%arg0: i32) -> (i32, i32, i32) {
    %c0_i32 = arith.constant 0 : i32
    %c0_i32_0 = arith.constant 0 : i32
    %c0_i32_1 = arith.constant 0 : i32
    return %arg0, %c0_i32, %c0_i32_0 : i32, i32, i32
  }
  func.func @transform_1(%arg0: i32) -> (i32, i32) {
    %c0_i32 = arith.constant 0 : i32
    %c0_i32_0 = arith.constant 0 : i32
    %c0_i32_1 = arith.constant 0 : i32
    return %c0_i32, %c0_i32_0 : i32, i32
  }
  func.func @transform_2(%arg0: i32) -> (i32, i32, i32) {
    %c0_i32 = arith.constant 0 : i32
    %c0_i32_0 = arith.constant 0 : i32
    %c0_i32_1 = arith.constant 0 : i32
    %c0_i32_2 = arith.constant 0 : i32
    return %c0_i32, %c0_i32_0, %c0_i32_1 : i32, i32, i32
  }
  func.func @transform_3(%arg0: i32) -> (i32, i32) {
    %c0_i32 = arith.constant 0 : i32
    %c0_i32_0 = arith.constant 0 : i32
    %c0_i32_1 = arith.constant 0 : i32
    return %c0_i32, %c0_i32_0 : i32, i32
  }
  func.func @transform_4(%arg0: i32) -> (i32, i32, i32) {
    %c0_i32 = arith.constant 0 : i32
    %c0_i32_0 = arith.constant 0 : i32
    %c0_i32_1 = arith.constant 0 : i32
    %c0_i32_2 = arith.constant 0 : i32
    return %c0_i32, %c0_i32_0, %c0_i32_1 : i32, i32, i32
  }
  func.func @transform_5(%arg0: i32) -> (i32, i32) {
    %c0_i32 = arith.constant 0 : i32
    %c0_i32_0 = arith.constant 0 : i32
    %c0_i32_1 = arith.constant 0 : i32
    return %c0_i32, %c0_i32_0 : i32, i32
  }
  func.func @transform_6(%arg0: i32) -> (i32, i32, i32) {
    %c0_i32 = arith.constant 0 : i32
    %c0_i32_0 = arith.constant 0 : i32
    %c0_i32_1 = arith.constant 0 : i32
    %c0_i32_2 = arith.constant 0 : i32
    return %c0_i32, %c0_i32_0, %c0_i32_1 : i32, i32, i32
  }
  func.func @transform_7(%arg0: i32) -> (i32, i32) {
    %c0_i32 = arith.constant 0 : i32
    %c0_i32_0 = arith.constant 0 : i32
    %c0_i32_1 = arith.constant 0 : i32
    return %c0_i32, %c0_i32_0 : i32, i32
  }
  func.func @transform_8(%arg0: i32) -> (i32, i32) {
    %c0_i32 = arith.constant 0 : i32
    %c0_i32_0 = arith.constant 0 : i32
    %c0_i32_1 = arith.constant 0 : i32
    return %c0_i32, %c0_i32_0 : i32, i32
  }
  func.func @transform_9(%arg0: i32) -> (i32, i32) {
    %c0_i32 = arith.constant 0 : i32
    %c0_i32_0 = arith.constant 0 : i32
    %c0_i32_1 = arith.constant 0 : i32
    return %c0_i32, %c0_i32_0 : i32, i32
  }
  func.func @transform_10(%arg0: i32) -> (i32, i32, i32) {
    %c0_i32 = arith.constant 0 : i32
    %c0_i32_0 = arith.constant 0 : i32
    %c0_i32_1 = arith.constant 0 : i32
    return %arg0, %c0_i32, %c0_i32_0 : i32, i32, i32
  }
}

</mosaic_0001>

<bundles_post_ra>
// kernel: rdb_forward.1
= control target key start
LH: loop header
LB: loop body
LE: loop exit
PB: predicated region body
PF: predicated region fallthrough
CT: control target
= control target key end

     0   :  { %s5680_s13 = smov 0   ;;  %s6539_s0 = inlined_call_operand.vmem [shape: f32[2,4,324], index: 0, kind: input, shape index: {}]   ;;  %s6540_s1 = inlined_call_operand.vmem [shape: f32[1,324], index: 1, kind: input, shape index: {}]   ;;  %s6541_s2 = inlined_call_operand.vmem [shape: f32[9,4,4], index: 2, kind: input, shape index: {}]   ;;  %s6542_s3 = inlined_call_operand.vmem [shape: f32[4,1], index: 3, kind: input, shape index: {}]   ;;  %s6543_s4 = inlined_call_operand.vmem [shape: f32[9,4,8], index: 4, kind: input, shape index: {}]   ;;  %s6544_s5 = inlined_call_operand.vmem [shape: f32[4,1], index: 5, kind: input, shape index: {}]   ;;  %s6545_s6 = inlined_call_operand.vmem [shape: f32[9,4,12], index: 6, kind: input, shape index: {}]   ;;  %s6546_s7 = inlined_call_operand.vmem [shape: f32[4,1], index: 7, kind: input, shape index: {}]   ;;  %s6547_s8 = inlined_call_operand.vmem [shape: f32[4,16], index: 8, kind: input, shape index: {}]   ;;  %s6548_s9 = inlined_call_operand.vmem [shape: f32[4,1], index: 9, kind: input, shape index: {}]   ;;  %s6549_s10 = inlined_call_operand.vmem [shape: f32[2,4,324], index: 10, kind: output, shape index: {}]  }
   0x1 LB: > { %s5210_s14 = sadd.s32 4294967295, %s5611_s13   ;;  %p5214_p0 = scmp.ge.s32.totalorder %s5611_s13, 1  ;;  %s5611_s13 = sphi %s5680_s13, %s20_s13  }
   0x2   : > { %p312_p1 = scmp.lt.s32.totalorder %s5611_s13, 3 }
   0x4   : > { %p313_p2 = pnand %p5214_p0, %p312_p1 }
   0x5   : > { %p350_p3 = scmp.lt.s32.totalorder (!%p313_p2), %s5210_s14, 1  ;;  %s5614_s19 = smov (!%p313_p2), 19  }
   0x6   : > { %316 = sbr.rel (%p313_p2) target bundleno = 1950 (0x79e), region = 60  ;;  %s5616_s20 = smov (!%p313_p2), 127  }
   0x7   : > { %s5617_s21 = smov (!%p313_p2), 126   ;;  %s5618_s22 = smov (!%p313_p2), 110  }
   0x8   : > { %s5619_s23 = smov (!%p313_p2), 109   ;;  %s5620_s24 = smov (!%p313_p2), 108  }
   0x9   : > { %s5621_s25 = smov (!%p313_p2), 92   ;;  %s5622_s26 = smov (!%p313_p2), 91  }
   0xa   : > { %s5624_s27 = smov (!%p313_p2), 90  }
   0xb   : > { %vm360_vm0 = vcmask 154624   ;;  %vm363_vm1 = vcmask 868024   ;;  %v5613_v0 = vmov 0.0   ;;  %s6551_s14 = smov (!%p350_p3, %s5210_s14), 1  ;;  %vm382_vm2 = vcmask 1043608  }
   0xc   : > { %361 = vst.msk [vmem:[#allocation2] sm:$0xff] %vm360_vm0, %v5613_v0  ;;  %362 = vst.msk [vmem:[#allocation2 + $0x18] sm:$0xff] %vm360_vm0, %v5613_v0  ;;  %5419 = vmatprep.subr.mxu1 %v5613_v0  ;;  %481 = vmatprep.mubr.f32.mxu0 %v5613_v0  ;;  %s5579_s15 = smul.u32 12, %s6551_s14  ;;  %vm385_vm3 = vcmask 707584   ;;  %vm5615_vm4 = vmmov 0   ;;  %v5623_v12 = vmov 0  }
   0xd   : > { %364 = vst.msk [vmem:[#allocation2 + $0x10] sm:$0xff] %vm363_vm1, %v5613_v0  ;;  %365 = vst.msk [vmem:[#allocation2 + $0x28] sm:$0xff] %vm363_vm1, %v5613_v0  ;;  %5421 = vmatprep.mubr.msk.f32.mxu1 %vm5615_vm4, %v5613_v0  ;;  %5600 = vset.pattern.permute.xlu1 %v5623_v12  ;;  %v1856_v13 = vld [vmem:[%s6542_s3] sm:$0xf]  ;;  %vm410_vm5 = vcmask 1043456   ;;  %vm406_vm6 = vcmask 31744  }
   0xe   : > { %s5704_s18 = scalar_lea.vmem %s6539_s0, %s5579_s15  ;;  %5601 = vset.pattern.permute.xlu0 %v5623_v12  ;;  %v5217_v18 = vld [vmem:[%s6541_s2 + $0x4] sm:$0xf]  ;;  %vm403_vm7 = vcmask 1039360   ;;  %v391_v21 = vld [vmem:[%s6541_s2] sm:$0xf]  ;;  %vm716_vm8 = vcmask 1031168   ;;  %s359_s11 = scalar_lea.vmem %s6549_s10, %s5579_s15 }
   0xf   : > { %v366_v1 = vld [vmem:[%s5704_s18] sm:$0xff]  ;;  %v367_v2 = vld [vmem:[%s5704_s18 + $0x8] sm:$0xf]  ;;  %vm880_vm9 = vcmask 900096   ;;  %v5234_v33 = vld [vmem:[%s6541_s2 + $0xc] sm:$0xf] }
  0x10   : > { %371 = vrot.lane.b32.xlu0 %v366_v1, %s5614_s19  ;;  %v5709_v3 = vcombine.high %v366_v1, %v366_v1  ;;  %375 = vrot.lane.b32.xlu1 %v367_v2, %s5614_s19  ;;  %v5228_v28 = vld [vmem:[%s6541_s2 + $0x8] sm:$0xf]  ;;  %vm1044_vm10 = vcmask 891904   ;;  %v5240_v38 = vld [vmem:[%s6541_s2 + $0x10] sm:$0xf]  ;;  %vm1208_vm11 = vcmask 883712  }
  0x11   : > { %v5246_v43 = vld [vmem:[%s6541_s2 + $0x14] sm:$0xf]  ;;  %vm1372_vm12 = vcmask 752640   ;;  %v5252_v48 = vld [vmem:[%s6541_s2 + $0x18] sm:$0xf]  ;;  %vm1536_vm13 = vcmask 744448  }
  0x12   : > { %v5258_v53 = vld [vmem:[%s6541_s2 + $0x1c] sm:$0xf]  ;;  %vm1700_vm14 = vcmask 736256   ;;  %v5264_v58 = vld [vmem:[%s6541_s2 + $0x20] sm:$0xf]  ;;  %vm1904_vm15 = vcmask 1047708  }
  0x13   : > { %vm1907_vm1 = vcmask 711684  }
  0x14   : > { %373 = vrot.lane.b32.xlu0 %v5709_v3, %s5614_s19 }
  0x82   : > { %v372_v4 = vpop.permute.xlu0 %371  ;;  %v376_v5 = vpop.permute.xlu1 %375 }
  0x83   : > { %383 = vst.msk [vmem:[#allocation2] sm:$0xf] %vm382_vm2, %v372_v4 }
  0x86   : > { %v374_v6 = vpop.permute.xlu0 %373 }
  0x87   : > { %v377_v7 = vsel %vm360_vm0, %v372_v4, %v374_v6  ;;  %v378_v8 = vsel %vm360_vm0, %v374_v6, %v376_v5 }
  0x88   : > { %384 = vst [vmem:[#allocation2 + $0x8] sm:$0xf] %v377_v7  ;;  %386 = vst.msk [vmem:[#allocation2 + $0x10] sm:$0xf] %vm385_vm3, %v378_v8 }
  0x8a   : > { %v5720_v9 = vld [vmem:[#allocation2] sm:$0xf] }
  0x8b   : > { %397 = vrot.lane.b32.xlu1 %v5720_v9, %s5616_s20  ;;  %710 = vrot.lane.b32.xlu0 %v5720_v9, %s5617_s21 }
  0x8f   : > { %874 = vrot.lane.b32.xlu1 %v5720_v9, %s5618_s22  ;;  %1038 = vrot.lane.b32.xlu0 %v5720_v9, %s5619_s23  ;;  %v390_v10 = vld [vmem:[#allocation2 + $0x10] sm:$0xf]  ;;  %v389_v11 = vld [vmem:[#allocation2 + $0x8] sm:$0xf] }
  0x93   : > { %1202 = vrot.lane.b32.xlu1 %v5720_v9, %s5620_s24  ;;  %401 = vrot.lane.b32.xlu0 %v390_v10, %s5616_s20 }
  0x97   : > { %1366 = vrot.lane.b32.xlu0 %v5720_v9, %s5621_s25  ;;  %399 = vrot.lane.b32.xlu1 %v389_v11, %s5616_s20 }
  0x9b   : > { %712 = vrot.lane.b32.xlu0 %v389_v11, %s5617_s21  ;;  %1530 = vrot.lane.b32.xlu1 %v5720_v9, %s5622_s26 }
  0x9f   : > { %878 = vrot.lane.b32.xlu0 %v390_v10, %s5618_s22  ;;  %714 = vrot.lane.b32.xlu1 %v390_v10, %s5617_s21 }
  0xa3   : > { %1040 = vrot.lane.b32.xlu0 %v389_v11, %s5619_s23  ;;  %876 = vrot.lane.b32.xlu1 %v389_v11, %s5618_s22 }
  0xa7   : > { %1206 = vrot.lane.b32.xlu0 %v390_v10, %s5620_s24  ;;  %1042 = vrot.lane.b32.xlu1 %v390_v10, %s5619_s23 }
  0xab   : > { %1368 = vrot.lane.b32.xlu0 %v389_v11, %s5621_s25  ;;  %1204 = vrot.lane.b32.xlu1 %v389_v11, %s5620_s24 }
  0xaf   : > { %1534 = vrot.lane.b32.xlu0 %v390_v10, %s5622_s26  ;;  %1370 = vrot.lane.b32.xlu1 %v390_v10, %s5621_s25 }
  0xb3   : > { %1696 = vrot.lane.b32.xlu0 %v389_v11, %s5624_s27  ;;  %1532 = vrot.lane.b32.xlu1 %v389_v11, %s5622_s26 }
  0xb7   : > { %1694 = vrot.lane.b32.xlu0 %v5720_v9, %s5624_s27  ;;  %1698 = vrot.lane.b32.xlu1 %v390_v10, %s5624_s27 }
  0xbb   : > { %1859 = vperm.xlu1 %5600, %v1856_v13  }
  0xfd   : > { %v398_v14 = vpop.permute.xlu1 %397  ;;  %v711_v15 = vpop.permute.xlu0 %710 }
 0x101   : > { %v875_v16 = vpop.permute.xlu1 %874  ;;  %v5757_v17 = vpop.permute.xlu0 %1038 }
 0x105   : > { %v5762_v19 = vpop.permute.xlu1 %1202  ;;  %v402_v20 = vpop.permute.xlu0 %401 }
 0x106   : > { %5420 = vmatpush3.msk.msra.mxu1 %vm410_vm5, %v402_v20 }
 0x107   : > { %5424 = vmatprep.subr.mxu1 %v5613_v0  ;;  %5422 = vmatmul.mubr.msk.f32.vlgmr.msra.gmra.mxu1 %vm406_vm6, %v5217_v18 }
 0x108   : > { %5425 = vmatpush3.msk.msra.mxu1 %vm410_vm5, %v390_v10  ;;  %5426 = vmatprep.mubr.msk.f32.mxu1 %vm5615_vm4, %v5613_v0 }
 0x109   : > { %v400_v22 = vpop.permute.xlu1 %399  ;;  %v5773_v23 = vpop.permute.xlu0 %1366  ;;  %5429 = vmatprep.subr.mxu1 %v5613_v0 }
 0x10a   : > { %v405_v24 = vsel %vm403_vm7, %v400_v22, %v402_v20  ;;  %v404_v25 = vsel %vm403_vm7, %v398_v14, %v400_v22 }
 0x10b   : > { %5218 = vmatprep.subr.msk.mxu0 %vm410_vm5, %v405_v24  ;;  %5427 = vmatmul.mubr.msk.f32.vlgmr.msra.gmra.mxu1 %vm406_vm6, %v391_v21 }
 0x10c   : > { %5219 = vmatpush1.msk.msra.mxu0 %vm410_vm5, %v404_v25  ;;  %5431 = vmatprep.mubr.msk.f32.mxu1 %vm5615_vm4, %v5613_v0 }
 0x10d   : > { %v5783_v26 = vpop.permute.xlu1 %1530  ;;  %5220 = vmatmul.mubr.msk.f32.vlgmr.msra.gmra.mxu0 %vm406_vm6, %v5217_v18  ;;  %5223 = vmatprep.subr.msk.mxu0 %vm410_vm5, %v389_v11  ;;  %v713_v27 = vpop.permute.xlu0 %712 }
 0x10e   : > { %5224 = vmatpush1.msk.msra.mxu0 %vm410_vm5, %v5720_v9  ;;  %631 = vmatprep.mubr.f32.mxu0 %v5613_v0  ;;  %v717_v32 = vsel %vm716_vm8, %v711_v15, %v713_v27 }
 0x111   : > { %v715_v29 = vpop.permute.xlu1 %714  ;;  %5225 = vmatmul.mubr.msk.f32.vlgmr.msra.gmra.mxu0 %vm406_vm6, %v391_v21  ;;  %v879_v30 = vpop.permute.xlu0 %878 }
 0x112   : > { %5430 = vmatpush3.msk.msra.mxu1 %vm410_vm5, %v715_v29  ;;  %v718_v31 = vsel %vm716_vm8, %v713_v27, %v715_v29  ;;  %792 = vmatprep.mubr.f32.mxu0 %v5613_v0 }
 0x113   : > { %5229 = vmatprep.subr.msk.mxu0 %vm410_vm5, %v718_v31  ;;  %5432 = vmatmul.mubr.msk.f32.vlgmr.msra.gmra.mxu1 %vm406_vm6, %v5228_v28 }
 0x114   : > { %5434 = vmatprep.subr.mxu1 %v5613_v0  ;;  %5230 = vmatpush1.msk.msra.mxu0 %vm410_vm5, %v717_v32 }
 0x115   : > { %5435 = vmatpush3.msk.msra.mxu1 %vm410_vm5, %v879_v30  ;;  %v877_v34 = vpop.permute.xlu1 %876  ;;  %5231 = vmatmul.mubr.msk.f32.vlgmr.msra.gmra.mxu0 %vm406_vm6, %v5228_v28  ;;  %v1041_v35 = vpop.permute.xlu0 %1040 }
 0x116   : > { %v881_v36 = vsel %vm880_vm9, %v875_v16, %v877_v34  ;;  %5436 = vmatprep.mubr.msk.f32.mxu1 %vm5615_vm4, %v5613_v0  ;;  %v882_v37 = vsel %vm880_vm9, %v877_v34, %v879_v30  ;;  %956 = vmatprep.mubr.f32.mxu0 %v5613_v0  ;;  %v1045_v42 = vsel %vm1044_vm10, %v5757_v17, %v1041_v35 }
 0x117   : > { %5235 = vmatprep.subr.msk.mxu0 %vm410_vm5, %v882_v37  ;;  %5437 = vmatmul.mubr.msk.f32.vlgmr.msra.gmra.mxu1 %vm406_vm6, %v5234_v33  ;;  %v1869_v37 = vlaneseq }
 0x118   : > { %5236 = vmatpush1.msk.msra.mxu0 %vm410_vm5, %v881_v36  ;;  %5439 = vmatprep.subr.mxu1 %v5613_v0 }
 0x119   : > { %v1043_v39 = vpop.permute.xlu1 %1042  ;;  %5237 = vmatmul.mubr.msk.f32.vlgmr.msra.gmra.mxu0 %vm406_vm6, %v5234_v33  ;;  %v1207_v40 = vpop.permute.xlu0 %1206  ;;  %5441 = vmatprep.mubr.msk.f32.mxu1 %vm5615_vm4, %v5613_v0 }
 0x11a   : > { %5440 = vmatpush3.msk.msra.mxu1 %vm410_vm5, %v1043_v39  ;;  %v1046_v41 = vsel %vm1044_vm10, %v1041_v35, %v1043_v39  ;;  %1120 = vmatprep.mubr.f32.mxu0 %v5613_v0 }
 0x11b   : > { %5241 = vmatprep.subr.msk.mxu0 %vm410_vm5, %v1046_v41  ;;  %5442 = vmatmul.mubr.msk.f32.vlgmr.msra.gmra.mxu1 %vm406_vm6, %v5240_v38 }
 0x11c   : > { %5444 = vmatprep.subr.mxu1 %v5613_v0  ;;  %5242 = vmatpush1.msk.msra.mxu0 %vm410_vm5, %v1045_v42 }
 0x11d   : > { %5445 = vmatpush3.msk.msra.mxu1 %vm410_vm5, %v1207_v40  ;;  %v1205_v44 = vpop.permute.xlu1 %1204  ;;  %5243 = vmatmul.mubr.msk.f32.vlgmr.msra.gmra.mxu0 %vm406_vm6, %v5240_v38  ;;  %v1369_v45 = vpop.permute.xlu0 %1368 }
 0x11e   : > { %v1209_v46 = vsel %vm1208_vm11, %v5762_v19, %v1205_v44  ;;  %5446 = vmatprep.mubr.msk.f32.mxu1 %vm5615_vm4, %v5613_v0  ;;  %v1210_v47 = vsel %vm1208_vm11, %v1205_v44, %v1207_v40  ;;  %1284 = vmatprep.mubr.f32.mxu0 %v5613_v0  ;;  %v1373_v52 = vsel %vm1372_vm12, %v5773_v23, %v1369_v45 }
 0x11f   : > { %5247 = vmatprep.subr.msk.mxu0 %vm410_vm5, %v1210_v47  ;;  %5447 = vmatmul.mubr.msk.f32.vlgmr.msra.gmra.mxu1 %vm406_vm6, %v5246_v43 }
 0x120   : > { %5248 = vmatpush1.msk.msra.mxu0 %vm410_vm5, %v1209_v46  ;;  %5449 = vmatprep.subr.mxu1 %v5613_v0 }
 0x121   : > { %v1371_v49 = vpop.permute.xlu1 %1370  ;;  %5249 = vmatmul.mubr.msk.f32.vlgmr.msra.gmra.mxu0 %vm406_vm6, %v5246_v43  ;;  %v1535_v50 = vpop.permute.xlu0 %1534  ;;  %5451 = vmatprep.mubr.msk.f32.mxu1 %vm5615_vm4, %v5613_v0 }
 0x122   : > { %v1374_v51 = vsel %vm1372_vm12, %v1369_v45, %v1371_v49  ;;  %5450 = vmatpush3.msk.msra.mxu1 %vm410_vm5, %v1371_v49  ;;  %1448 = vmatprep.mubr.f32.mxu0 %v5613_v0 }
 0x123   : > { %5253 = vmatprep.subr.msk.mxu0 %vm410_vm5, %v1374_v51  ;;  %5452 = vmatmul.mubr.msk.f32.vlgmr.msra.gmra.mxu1 %vm406_vm6, %v5252_v48 }
 0x124   : > { %5454 = vmatprep.subr.mxu1 %v5613_v0  ;;  %5254 = vmatpush1.msk.msra.mxu0 %vm410_vm5, %v1373_v52 }
 0x125   : > { %5455 = vmatpush3.msk.msra.mxu1 %vm410_vm5, %v1535_v50  ;;  %v1533_v54 = vpop.permute.xlu1 %1532  ;;  %5255 = vmatmul.mubr.msk.f32.vlgmr.msra.gmra.mxu0 %vm406_vm6, %v5252_v48  ;;  %v1697_v55 = vpop.permute.xlu0 %1696  ;;  %v1870_v48 = vshrl.u32 %v1869_v37, 7  ;;  %v1912_v37 = vld [vmem:[%s6543_s4] sm:$0xf] }
 0x126   : > { %v1537_v56 = vsel %vm1536_vm13, %v5783_v26, %v1533_v54  ;;  %v1538_v57 = vsel %vm1536_vm13, %v1533_v54, %v1535_v50  ;;  %5456 = vmatprep.mubr.msk.f32.mxu1 %vm5615_vm4, %v5613_v0  ;;  %1612 = vmatprep.mubr.f32.mxu0 %v5613_v0 }
 0x127   : > { %5259 = vmatprep.subr.msk.mxu0 %vm410_vm5, %v1538_v57  ;;  %5457 = vmatmul.mubr.msk.f32.vlgmr.msra.gmra.mxu1 %vm406_vm6, %v5258_v53 }
 0x128   : > { %5260 = vmatpush1.msk.msra.mxu0 %vm410_vm5, %v1537_v56  ;;  %5459 = vmatprep.subr.mxu1 %v5613_v0 }
 0x129   : > { %v1699_v59 = vpop.permute.xlu1 %1698  ;;  %5261 = vmatmul.mubr.msk.f32.vlgmr.msra.gmra.mxu0 %vm406_vm6, %v5258_v53  ;;  %v1695_v60 = vpop.permute.xlu0 %1694  ;;  %5461 = vmatprep.mubr.msk.f32.mxu1 %vm5615_vm4, %v5613_v0 }
 0x12a   : > { %v1702_v61 = vsel %vm1700_vm14, %v1697_v55, %v1699_v59  ;;  %v1701_v62 = vsel %vm1700_vm14, %v1695_v60, %v1697_v55  ;;  %5460 = vmatpush3.msk.msra.mxu1 %vm410_vm5, %v1699_v59  ;;  %1776 = vmatprep.mubr.f32.mxu0 %v5613_v0 }
 0x12b   : > { %5265 = vmatprep.subr.msk.mxu0 %vm410_vm5, %v1702_v61  ;;  %5462 = vmatmul.mubr.msk.f32.vlgmr.msra.gmra.mxu1 %vm406_vm6, %v5264_v58  ;;  %v1879_v61 = vsub.s32 2, %v1870_v48 }
 0x12c   : > { %5266 = vmatpush1.msk.msra.mxu0 %vm410_vm5, %v1701_v62  ;;  %5464 = vmatprep.subr.mxu1 %v5613_v0 }
 0x12d   : > { %5267 = vmatmul.mubr.msk.f32.vlgmr.msra.gmra.mxu0 %vm406_vm6, %v5264_v58  ;;  %5466 = vmatprep.mubr.msk.f32.mxu1 %vm5615_vm4, %v5613_v0  ;;  %v1871_v58 = vsub.s32 0, %v1870_v48  ;;  %vm1929_vm6 = vcmask 64512  }
 0x12e   : > { %1997 = vmatprep.mubr.f32.mxu0 %v5613_v0 }
 0x136   : > { %v1860_v52 = vpop.permute.xlu1 %1859 }
 0x1c7   : > { %v554_v63 = vpop.f32.mrf.mxu1 }
 0x1c9   : > { %v5423_v1 = vpop.f32.mrf.mxu1 }
 0x1cb   : > { %v704_v2 = vpop.f32.mrf.mxu1 }
 0x1cc   : > { %v705_v14 = vadd.f32 %v704_v2, %v554_v63  ;;  %v387_v2 = vld [vmem:[%s6540_s1] sm:$0x7] }
 0x1cd   : > { %v483_v4 = vpop.f32.mrf.mxu0  ;;  %v5428_v5 = vpop.f32.mrf.mxu1 }
 0x1cf   : > { %v485_v6 = vpop.f32.mrf.mxu0 }
 0x1d1   : > { %v633_v7 = vpop.f32.mrf.mxu0 }
 0x1d2   : > { %v634_v24 = vadd.f32 %v633_v7, %v483_v4  ;;  %v1875_v4 = vsub.s32 1, %v1870_v48 }
 0x1d3   : > { %v635_v8 = vpop.f32.mrf.mxu0  ;;  %v865_v9 = vpop.f32.mrf.mxu1 }
 0x1d4   : > { %v871_v19 = vadd.f32 %v865_v9, %v705_v14  ;;  %v636_v28 = vadd.f32 %v635_v8, %v485_v6  ;;  %v5897_v8 = vrot.slane %v387_v2, %v1871_v58  ;;  %v5899_v9 = vrot.slane %v387_v2, %v1879_v61 }
 0x1d5   : > { %v794_v10 = vpop.f32.mrf.mxu0  ;;  %v5433_v11 = vpop.f32.mrf.mxu1 }
 0x1d6   : > { %v869_v29 = vadd.f32 %v794_v10, %v634_v24 }
 0x1d7   : > { %v796_v12 = vpop.f32.mrf.mxu0  ;;  %v1029_v13 = vpop.f32.mrf.mxu1 }
 0x1d8   : > { %v1035_v25 = vadd.f32 %v1029_v13, %v871_v19  ;;  %v870_v32 = vadd.f32 %v796_v12, %v636_v28  ;;  %v5901_v13 = vrot.slane %v387_v2, %v1875_v4 }
 0x1d9   : > { %v958_v15 = vpop.f32.mrf.mxu0  ;;  %v5438_v16 = vpop.f32.mrf.mxu1 }
 0x1da   : > { %v1033_v33 = vadd.f32 %v958_v15, %v869_v29  ;;  %v3338_v29 = vld [vmem:[%s6544_s5] sm:$0xf] }
 0x1db   : > { %v960_v17 = vpop.f32.mrf.mxu0  ;;  %v1193_v18 = vpop.f32.mrf.mxu1 }
 0x1dc   : > { %v1199_v34 = vadd.f32 %v1193_v18, %v1035_v25  ;;  %v1034_v38 = vadd.f32 %v960_v17, %v870_v32 }
 0x1dd   : > { %v1122_v20 = vpop.f32.mrf.mxu0  ;;  %v5443_v21 = vpop.f32.mrf.mxu1 }
 0x1de   : > { %v1197_v39 = vadd.f32 %v1122_v20, %v1033_v33 }
 0x1df   : > { %v1124_v22 = vpop.f32.mrf.mxu0  ;;  %v1357_v23 = vpop.f32.mrf.mxu1 }
 0x1e0   : > { %v1363_v40 = vadd.f32 %v1357_v23, %v1199_v34  ;;  %v1198_v43 = vadd.f32 %v1124_v22, %v1034_v38  ;;  %v5270_v34 = vld [vmem:[%s6543_s4 + $0x4] sm:$0xf] }
 0x1e1   : > { %v1286_v26 = vpop.f32.mrf.mxu0  ;;  %v5448_v27 = vpop.f32.mrf.mxu1 }
 0x1e2   : > { %v1361_v44 = vadd.f32 %v1286_v26, %v1197_v39 }
 0x1e3   : > { %v1288_v30 = vpop.f32.mrf.mxu0  ;;  %v1521_v31 = vpop.f32.mrf.mxu1 }
 0x1e4   : > { %v1527_v45 = vadd.f32 %v1521_v31, %v1363_v40  ;;  %v1362_v49 = vadd.f32 %v1288_v30, %v1198_v43 }
 0x1e5   : > { %v1450_v35 = vpop.f32.mrf.mxu0  ;;  %v5453_v36 = vpop.f32.mrf.mxu1 }
 0x1e6   : > { %v1525_v50 = vadd.f32 %v1450_v35, %v1361_v44  ;;  %v5275_v44 = vld [vmem:[%s6543_s4 + $0x8] sm:$0xf] }
 0x1e7   : > { %v1452_v41 = vpop.f32.mrf.mxu0  ;;  %v1685_v42 = vpop.f32.mrf.mxu1 }
 0x1e8   : > { %v1691_v51 = vadd.f32 %v1685_v42, %v1527_v45  ;;  %v1526_v55 = vadd.f32 %v1452_v41, %v1362_v49  ;;  %v5278_v49 = vld [vmem:[%s6543_s4 + $0xc] sm:$0xf] }
 0x1e9   : > { %v1614_v46 = vpop.f32.mrf.mxu0  ;;  %v5458_v47 = vpop.f32.mrf.mxu1 }
 0x1ea   : > { %v1689_v56 = vadd.f32 %v1614_v46, %v1525_v50 }
 0x1eb   : > { %v1616_v53 = vpop.f32.mrf.mxu0  ;;  %v1849_v54 = vpop.f32.mrf.mxu1 }
 0x1ec   : > { %v1855_v57 = vadd.f32 %v1849_v54, %v1691_v51  ;;  %v1690_v62 = vadd.f32 %v1616_v53, %v1526_v55  ;;  %v5281_v54 = vld [vmem:[%s6543_s4 + $0x10] sm:$0xf] }
 0x1ed   : > { %v1778_v59 = vpop.f32.mrf.mxu0  ;;  %v5463_v60 = vpop.f32.mrf.mxu1 }
 0x1ee   : > { %v1864_v63 = vadd.f32 %v1860_v52, %v1855_v57  ;;  %v1853_v1 = vadd.f32 %v1778_v59, %v1689_v56  ;;  %v5284_v59 = vld [vmem:[%s6543_s4 + $0x14] sm:$0xf] }
 0x1ef   : > { %v1780_v5 = vpop.f32.mrf.mxu0 }
 0x1f0   : > { %v1862_v6 = vadd.f32 %v1860_v52, %v1853_v1  ;;  %v1854_v7 = vadd.f32 %v1780_v5, %v1690_v62  ;;  %v1867_v10 = vmax.f32 %v1864_v63, 0.0  ;;  %v5287_v1 = vld [vmem:[%s6543_s4 + $0x18] sm:$0xf] }
 0x1f2   : > { %v1865_v11 = vmax.f32 %v1862_v6, 0.0  ;;  %v1863_v12 = vadd.f32 %v1860_v52, %v1854_v7  ;;  %v1886_v18 = vmul.f32 %v5899_v9, %v1867_v10  ;;  %v5290_v7 = vld [vmem:[%s6543_s4 + $0x1c] sm:$0xf] }
 0x1f4   : > { %v1866_v14 = vmax.f32 %v1863_v12, 0.0  ;;  %v1884_v15 = vmul.f32 %v5897_v8, %v1865_v11  ;;  %v1892_v20 = vrot.slane %v1886_v18, 4 }
 0x1f6   : > { %v1890_v16 = vrot.slane %v1884_v15, 4  ;;  %v1885_v17 = vmul.f32 %v5901_v13, %v1866_v14  ;;  %v5293_v15 = vld [vmem:[%s6543_s4 + $0x20] sm:$0xf] }
 0x1f8   : > { %1893 = vrot.lane.b32.xlu0 %v1890_v16, %s5614_s19  ;;  %v1891_v19 = vrot.slane %v1885_v17, 4 }
 0x1fa   : > { %1895 = vrot.lane.b32.xlu1 %v1891_v19, %s5614_s19 }
 0x1fc   : > { %1897 = vrot.lane.b32.xlu0 %v1892_v20, %s5614_s19 }
 0x26a   : > { %v1894_v21 = vpop.permute.xlu0 %1893 }
 0x26b   : > { %1905 = vst.msk [vmem:[#allocation2] sm:$0xf0] %vm1904_vm15, %v1894_v21 }
 0x26c   : > { %v1896_v22 = vpop.permute.xlu1 %1895 }
 0x26d   : > { %v1899_v23 = vsel %vm360_vm0, %v1894_v21, %v1896_v22 }
 0x26e   : > { %1906 = vst [vmem:[#allocation2 + $0x8] sm:$0xf0] %v1899_v23  ;;  %v1898_v24 = vpop.permute.xlu0 %1897 }
 0x26f   : > { %v1900_v25 = vsel %vm360_vm0, %v1896_v22, %v1898_v24 }
 0x270   : > { %1908 = vst.msk [vmem:[#allocation2 + $0x10] sm:$0xf0] %vm1907_vm1, %v1900_v25 }
 0x272   : > { %v5913_v26 = vld [vmem:[#allocation2] sm:$0xff] }
 0x273   : > { %2220 = vrot.lane.b32.xlu0 %v5913_v26, %s5617_s21  ;;  %1918 = vrot.lane.b32.xlu1 %v5913_v26, %s5616_s20 }
 0x275   : > { %v5929_v28 = vld [vmem:[#allocation2 + $0x8] sm:$0xff] }
 0x277   : > { %2540 = vrot.lane.b32.xlu0 %v5913_v26, %s5619_s23  ;;  %2380 = vrot.lane.b32.xlu1 %v5913_v26, %s5618_s22  ;;  %v5923_v27 = vld [vmem:[#allocation2 + $0x10] sm:$0xff] }
 0x27b   : > { %2700 = vrot.lane.b32.xlu1 %v5913_v26, %s5620_s24  ;;  %1922 = vrot.lane.b32.xlu0 %v5923_v27, %s5616_s20 }
 0x27f   : > { %2860 = vrot.lane.b32.xlu0 %v5913_v26, %s5621_s25  ;;  %1920 = vrot.lane.b32.xlu1 %v5929_v28, %s5616_s20 }
 0x283   : > { %2222 = vrot.lane.b32.xlu0 %v5929_v28, %s5617_s21  ;;  %3020 = vrot.lane.b32.xlu1 %v5913_v26, %s5622_s26 }
 0x287   : > { %2384 = vrot.lane.b32.xlu0 %v5923_v27, %s5618_s22  ;;  %2224 = vrot.lane.b32.xlu1 %v5923_v27, %s5617_s21 }
 0x28b   : > { %2542 = vrot.lane.b32.xlu0 %v5929_v28, %s5619_s23  ;;  %2382 = vrot.lane.b32.xlu1 %v5929_v28, %s5618_s22 }
 0x28f   : > { %2704 = vrot.lane.b32.xlu0 %v5923_v27, %s5620_s24  ;;  %2544 = vrot.lane.b32.xlu1 %v5923_v27, %s5619_s23 }
 0x293   : > { %2862 = vrot.lane.b32.xlu0 %v5929_v28, %s5621_s25  ;;  %2702 = vrot.lane.b32.xlu1 %v5929_v28, %s5620_s24 }
 0x297   : > { %3024 = vrot.lane.b32.xlu0 %v5923_v27, %s5622_s26  ;;  %2864 = vrot.lane.b32.xlu1 %v5923_v27, %s5621_s25 }
 0x29b   : > { %3182 = vrot.lane.b32.xlu0 %v5929_v28, %s5624_s27  ;;  %3022 = vrot.lane.b32.xlu1 %v5929_v28, %s5622_s26 }
 0x29f   : > { %3180 = vrot.lane.b32.xlu0 %v5913_v26, %s5624_s27  ;;  %3184 = vrot.lane.b32.xlu1 %v5923_v27, %s5624_s27 }
 0x2a3   : > { %3341 = vperm.xlu1 %5600, %v3338_v29  }
 0x2e5   : > { %v2221_v30 = vpop.permute.xlu0 %2220  ;;  %v1919_v31 = vpop.permute.xlu1 %1918 }
 0x2e9   : > { %v2541_v32 = vpop.permute.xlu0 %2540  ;;  %v2381_v33 = vpop.permute.xlu1 %2380 }
 0x2ed   : > { %v1923_v35 = vpop.permute.xlu0 %1922  ;;  %v5973_v36 = vpop.permute.xlu1 %2700 }
 0x2ee   : > { %5465 = vmatpush3.msra.mxu1 %v1923_v35 }
 0x2ef   : > { %5469 = vmatprep.subr.mxu1 %v5613_v0  ;;  %5467 = vmatmul.mubr.msk.f32.vlgmr.msra.gmra.mxu1 %vm1929_vm6, %v5270_v34 }
 0x2f0   : > { %5470 = vmatpush3.msra.mxu1 %v5923_v27  ;;  %5471 = vmatprep.mubr.msk.f32.mxu1 %vm5615_vm4, %v5613_v0 }
 0x2f1   : > { %v5983_v38 = vpop.permute.xlu0 %2860  ;;  %v1921_v39 = vpop.permute.xlu1 %1920  ;;  %5474 = vmatprep.subr.mxu1 %v5613_v0 }
 0x2f2   : > { %v1924_v40 = vsel %vm403_vm7, %v1919_v31, %v1921_v39  ;;  %v1925_v41 = vsel %vm403_vm7, %v1921_v39, %v1923_v35 }
 0x2f3   : > { %1963 = vmatprep.subr.mxu0 %v1925_v41  ;;  %5472 = vmatmul.mubr.msk.f32.vlgmr.msra.gmra.mxu1 %vm1929_vm6, %v1912_v37 }
 0x2f4   : > { %1964 = vmatpush1.msra.mxu0 %v1924_v40  ;;  %5476 = vmatprep.mubr.msk.f32.mxu1 %vm5615_vm4, %v5613_v0 }
 0x2f5   : > { %v2223_v42 = vpop.permute.xlu0 %2222  ;;  %5271 = vmatmul.mubr.msk.f32.vlgmr.msra.gmra.mxu0 %vm1929_vm6, %v5270_v34  ;;  %2107 = vmatprep.subr.mxu0 %v5929_v28  ;;  %v5993_v43 = vpop.permute.xlu1 %3020 }
 0x2f6   : > { %2108 = vmatpush1.msra.mxu0 %v5913_v26  ;;  %2141 = vmatprep.mubr.f32.mxu0 %v5613_v0  ;;  %v2226_v48 = vsel %vm716_vm8, %v2221_v30, %v2223_v42 }
 0x2f9   : > { %v2385_v45 = vpop.permute.xlu0 %2384  ;;  %5273 = vmatmul.mubr.msk.f32.vlgmr.msra.gmra.mxu0 %vm1929_vm6, %v1912_v37  ;;  %v2225_v46 = vpop.permute.xlu1 %2224 }
 0x2fa   : > { %5475 = vmatpush3.msra.mxu1 %v2225_v46  ;;  %v2227_v47 = vsel %vm716_vm8, %v2223_v42, %v2225_v46  ;;  %2298 = vmatprep.mubr.f32.mxu0 %v5613_v0 }
 0x2fb   : > { %2264 = vmatprep.subr.mxu0 %v2227_v47  ;;  %5477 = vmatmul.mubr.msk.f32.vlgmr.msra.gmra.mxu1 %vm1929_vm6, %v5275_v44 }
 0x2fc   : > { %5479 = vmatprep.subr.mxu1 %v5613_v0  ;;  %2265 = vmatpush1.msra.mxu0 %v2226_v48 }
 0x2fd   : > { %5480 = vmatpush3.msra.mxu1 %v2385_v45  ;;  %v2543_v50 = vpop.permute.xlu0 %2542  ;;  %5276 = vmatmul.mubr.msk.f32.vlgmr.msra.gmra.mxu0 %vm1929_vm6, %v5275_v44  ;;  %v2383_v51 = vpop.permute.xlu1 %2382 }
 0x2fe   : > { %v2386_v52 = vsel %vm880_vm9, %v2381_v33, %v2383_v51  ;;  %5481 = vmatprep.mubr.msk.f32.mxu1 %vm5615_vm4, %v5613_v0  ;;  %v2387_v53 = vsel %vm880_vm9, %v2383_v51, %v2385_v45  ;;  %2458 = vmatprep.mubr.f32.mxu0 %v5613_v0  ;;  %v2546_v58 = vsel %vm1044_vm10, %v2541_v32, %v2543_v50 }
 0x2ff   : > { %2424 = vmatprep.subr.mxu0 %v2387_v53  ;;  %5482 = vmatmul.mubr.msk.f32.vlgmr.msra.gmra.mxu1 %vm1929_vm6, %v5278_v49 }
 0x300   : > { %2425 = vmatpush1.msra.mxu0 %v2386_v52  ;;  %5484 = vmatprep.subr.mxu1 %v5613_v0 }
 0x301   : > { %v2705_v55 = vpop.permute.xlu0 %2704  ;;  %5279 = vmatmul.mubr.msk.f32.vlgmr.msra.gmra.mxu0 %vm1929_vm6, %v5278_v49  ;;  %v2545_v56 = vpop.permute.xlu1 %2544  ;;  %5486 = vmatprep.mubr.msk.f32.mxu1 %vm5615_vm4, %v5613_v0 }
 0x302   : > { %5485 = vmatpush3.msra.mxu1 %v2545_v56  ;;  %v2547_v57 = vsel %vm1044_vm10, %v2543_v50, %v2545_v56  ;;  %2618 = vmatprep.mubr.f32.mxu0 %v5613_v0 }
 0x303   : > { %2584 = vmatprep.subr.mxu0 %v2547_v57  ;;  %5487 = vmatmul.mubr.msk.f32.vlgmr.msra.gmra.mxu1 %vm1929_vm6, %v5281_v54 }
 0x304   : > { %5489 = vmatprep.subr.mxu1 %v5613_v0  ;;  %2585 = vmatpush1.msra.mxu0 %v2546_v58 }
 0x305   : > { %5490 = vmatpush3.msra.mxu1 %v2705_v55  ;;  %v2863_v60 = vpop.permute.xlu0 %2862  ;;  %5282 = vmatmul.mubr.msk.f32.vlgmr.msra.gmra.mxu0 %vm1929_vm6, %v5281_v54  ;;  %v2703_v61 = vpop.permute.xlu1 %2702 }
 0x306   : > { %v2706_v62 = vsel %vm1208_vm11, %v5973_v36, %v2703_v61  ;;  %5491 = vmatprep.mubr.msk.f32.mxu1 %vm5615_vm4, %v5613_v0  ;;  %v2707_v63 = vsel %vm1208_vm11, %v2703_v61, %v2705_v55  ;;  %2778 = vmatprep.mubr.f32.mxu0 %v5613_v0  ;;  %v2866_v6 = vsel %vm1372_vm12, %v5983_v38, %v2863_v60 }
 0x307   : > { %2744 = vmatprep.subr.mxu0 %v2707_v63  ;;  %5492 = vmatmul.mubr.msk.f32.vlgmr.msra.gmra.mxu1 %vm1929_vm6, %v5284_v59 }
 0x308   : > { %2745 = vmatpush1.msra.mxu0 %v2706_v62  ;;  %5494 = vmatprep.subr.mxu1 %v5613_v0 }
 0x309   : > { %v3025_v2 = vpop.permute.xlu0 %3024  ;;  %5285 = vmatmul.mubr.msk.f32.vlgmr.msra.gmra.mxu0 %vm1929_vm6, %v5284_v59  ;;  %v2865_v4 = vpop.permute.xlu1 %2864  ;;  %5496 = vmatprep.mubr.msk.f32.mxu1 %vm5615_vm4, %v5613_v0 }
 0x30a   : > { %5495 = vmatpush3.msra.mxu1 %v2865_v4  ;;  %v2867_v5 = vsel %vm1372_vm12, %v2863_v60, %v2865_v4  ;;  %2938 = vmatprep.mubr.f32.mxu0 %v5613_v0 }
 0x30b   : > { %2904 = vmatprep.subr.mxu0 %v2867_v5  ;;  %5497 = vmatmul.mubr.msk.f32.vlgmr.msra.gmra.mxu1 %vm1929_vm6, %v5287_v1 }
 0x30c   : > { %5499 = vmatprep.subr.mxu1 %v5613_v0  ;;  %2905 = vmatpush1.msra.mxu0 %v2866_v6 }
 0x30d   : > { %5500 = vmatpush3.msra.mxu1 %v3025_v2  ;;  %v3183_v10 = vpop.permute.xlu0 %3182  ;;  %5288 = vmatmul.mubr.msk.f32.vlgmr.msra.gmra.mxu0 %vm1929_vm6, %v5287_v1  ;;  %v3023_v11 = vpop.permute.xlu1 %3022 }
 0x30e   : > { %v3026_v12 = vsel %vm1536_vm13, %v5993_v43, %v3023_v11  ;;  %5501 = vmatprep.mubr.msk.f32.mxu1 %vm5615_vm4, %v5613_v0  ;;  %v3027_v14 = vsel %vm1536_vm13, %v3023_v11, %v3025_v2  ;;  %3098 = vmatprep.mubr.f32.mxu0 %v5613_v0 }
 0x30f   : > { %3064 = vmatprep.subr.mxu0 %v3027_v14  ;;  %5502 = vmatmul.mubr.msk.f32.vlgmr.msra.gmra.mxu1 %vm1929_vm6, %v5290_v7 }
 0x310   : > { %3065 = vmatpush1.msra.mxu0 %v3026_v12  ;;  %5504 = vmatprep.subr.mxu1 %v5613_v0 }
 0x311   : > { %v3181_v16 = vpop.permute.xlu0 %3180  ;;  %5291 = vmatmul.mubr.msk.f32.vlgmr.msra.gmra.mxu0 %vm1929_vm6, %v5290_v7  ;;  %v3185_v17 = vpop.permute.xlu1 %3184  ;;  %5506 = vmatprep.mubr.msk.f32.mxu1 %vm5615_vm4, %v5613_v0 }
 0x312   : > { %v3186_v18 = vsel %vm1700_vm14, %v3181_v16, %v3183_v10  ;;  %5505 = vmatpush3.msra.mxu1 %v3185_v17  ;;  %v3187_v19 = vsel %vm1700_vm14, %v3183_v10, %v3185_v17  ;;  %3258 = vmatprep.mubr.f32.mxu0 %v5613_v0 }
 0x313   : > { %3224 = vmatprep.subr.mxu0 %v3187_v19  ;;  %5507 = vmatmul.mubr.msk.f32.vlgmr.msra.gmra.mxu1 %vm1929_vm6, %v5293_v15 }
 0x314   : > { %3225 = vmatpush1.msra.mxu0 %v3186_v18  ;;  %5509 = vmatprep.subr.mxu1 %v5613_v0 }
 0x315   : > { %5294 = vmatmul.mubr.msk.f32.vlgmr.msra.gmra.mxu0 %vm1929_vm6, %v5293_v15  ;;  %5513 = vmatprep.mubr.msk.f32.mxu1 %vm5615_vm4, %v5613_v0 }
 0x316   : > { %3478 = vmatprep.mubr.f32.mxu0 %v5613_v0 }
 0x3af   : > { %v2070_v20 = vpop.f32.mrf.mxu1 }
 0x3b1   : > { %v5468_v21 = vpop.f32.mrf.mxu1 }
 0x3b3   : > { %v2214_v22 = vpop.f32.mrf.mxu1 }
 0x3b4   : > { %v2215_v29 = vadd.f32 %v2214_v22, %v2070_v20  ;;  %v3342_v22 = vpop.permute.xlu1 %3341 }
 0x3b5   : > { %v1999_v23 = vpop.f32.mrf.mxu0  ;;  %v5473_v24 = vpop.f32.mrf.mxu1 }
 0x3b7   : > { %v2001_v25 = vpop.f32.mrf.mxu0 }
 0x3b9   : > { %v2143_v30 = vpop.f32.mrf.mxu0 }
 0x3ba   : > { %v2144_v48 = vadd.f32 %v2143_v30, %v1999_v23 }
 0x3bb   : > { %v2145_v31 = vpop.f32.mrf.mxu0  ;;  %v2371_v32 = vpop.f32.mrf.mxu1 }
 0x3bc   : > { %v2377_v33 = vadd.f32 %v2371_v32, %v2215_v29  ;;  %v2146_v52 = vadd.f32 %v2145_v31, %v2001_v25 }
 0x3bd   : > { %v2300_v34 = vpop.f32.mrf.mxu0  ;;  %v5478_v35 = vpop.f32.mrf.mxu1 }
 0x3be   : > { %v2375_v53 = vadd.f32 %v2300_v34, %v2144_v48 }
 0x3bf   : > { %v2302_v36 = vpop.f32.mrf.mxu0  ;;  %v2531_v37 = vpop.f32.mrf.mxu1 }
 0x3c0   : > { %v2537_v38 = vadd.f32 %v2531_v37, %v2377_v33  ;;  %v2376_v56 = vadd.f32 %v2302_v36, %v2146_v52 }
 0x3c1   : > { %v2460_v39 = vpop.f32.mrf.mxu0  ;;  %v5483_v40 = vpop.f32.mrf.mxu1 }
 0x3c2   : > { %v2535_v57 = vadd.f32 %v2460_v39, %v2375_v53 }
 0x3c3   : > { %v2462_v41 = vpop.f32.mrf.mxu0  ;;  %v2691_v42 = vpop.f32.mrf.mxu1 }
 0x3c4   : > { %v2697_v43 = vadd.f32 %v2691_v42, %v2537_v38  ;;  %v2536_v61 = vadd.f32 %v2462_v41, %v2376_v56 }
 0x3c5   : > { %v2620_v44 = vpop.f32.mrf.mxu0  ;;  %v5488_v45 = vpop.f32.mrf.mxu1 }
 0x3c6   : > { %v2695_v62 = vadd.f32 %v2620_v44, %v2535_v57 }
 0x3c7   : > { %v2622_v46 = vpop.f32.mrf.mxu0  ;;  %v2851_v47 = vpop.f32.mrf.mxu1 }
 0x3c8   : > { %v2857_v49 = vadd.f32 %v2851_v47, %v2697_v43  ;;  %v2696_v2 = vadd.f32 %v2622_v46, %v2536_v61 }
 0x3c9   : > { %v2780_v50 = vpop.f32.mrf.mxu0  ;;  %v5493_v51 = vpop.f32.mrf.mxu1 }
 0x3ca   : > { %v2855_v4 = vadd.f32 %v2780_v50, %v2695_v62 }
 0x3cb   : > { %v2782_v54 = vpop.f32.mrf.mxu0  ;;  %v3011_v55 = vpop.f32.mrf.mxu1 }
 0x3cc   : > { %v3017_v58 = vadd.f32 %v3011_v55, %v2857_v49  ;;  %v2856_v10 = vadd.f32 %v2782_v54, %v2696_v2 }
 0x3cd   : > { %v2940_v59 = vpop.f32.mrf.mxu0  ;;  %v5498_v60 = vpop.f32.mrf.mxu1 }
 0x3ce   : > { %v3015_v11 = vadd.f32 %v2940_v59, %v2855_v4 }
 0x3cf   : > { %v2942_v63 = vpop.f32.mrf.mxu0  ;;  %v3171_v1 = vpop.f32.mrf.mxu1 }
 0x3d0   : > { %v3177_v5 = vadd.f32 %v3171_v1, %v3017_v58  ;;  %v3016_v15 = vadd.f32 %v2942_v63, %v2856_v10 }
 0x3d1   : > { %v3100_v6 = vpop.f32.mrf.mxu0  ;;  %v5503_v7 = vpop.f32.mrf.mxu1 }
 0x3d2   : > { %v3175_v16 = vadd.f32 %v3100_v6, %v3015_v11 }
 0x3d3   : > { %v3102_v12 = vpop.f32.mrf.mxu0  ;;  %v3331_v14 = vpop.f32.mrf.mxu1 }
 0x3d4   : > { %v3337_v17 = vadd.f32 %v3331_v14, %v3177_v5  ;;  %v3176_v20 = vadd.f32 %v3102_v12, %v3016_v15 }
 0x3d5   : > { %v3260_v18 = vpop.f32.mrf.mxu0  ;;  %v5508_v19 = vpop.f32.mrf.mxu1 }
 0x3d6   : > { %v3335_v21 = vadd.f32 %v3260_v18, %v3175_v16  ;;  %v3346_v24 = vadd.f32 %v3342_v22, %v3337_v17  ;;  %v4923_v18 = vld [vmem:[%s6546_s7] sm:$0xf] }
 0x3d7   : > { %v3262_v23 = vpop.f32.mrf.mxu0 }
 0x3d8   : > { %v3344_v25 = vadd.f32 %v3342_v22, %v3335_v21  ;;  %v3336_v29 = vadd.f32 %v3262_v23, %v3176_v20  ;;  %v3349_v32 = vmax.f32 %v3346_v24, 0.0  ;;  %v6264_v23 = vld [vmem:[%s6545_s6 + $0x4] sm:$0xf] }
 0x3da   : > { %v3347_v30 = vmax.f32 %v3344_v25, 0.0  ;;  %v3345_v31 = vadd.f32 %v3342_v22, %v3336_v29  ;;  %v3352_v36 = vmul.f32 %v3349_v32, %v5899_v9  ;;  %v6282_v29 = vld [vmem:[%s6545_s6] sm:$0xf]  ;;  %v6297_v32 = vld [vmem:[%s6545_s6 + $0x8] sm:$0xf] }
 0x3dc   : > { %v3348_v33 = vmax.f32 %v3345_v31, 0.0  ;;  %v3350_v34 = vmul.f32 %v3347_v30, %v5897_v8 }
 0x3de   : > { %3356 = vrot.lane.b32.xlu0 %v3350_v34, %s5614_s19  ;;  %v3351_v35 = vmul.f32 %v3348_v33, %v5901_v13  ;;  %v6315_v34 = vld [vmem:[%s6545_s6 + $0xc] sm:$0xf] }
 0x3e0   : > { %3358 = vrot.lane.b32.xlu1 %v3351_v35, %s5614_s19 }
 0x3e2   : > { %3360 = vrot.lane.b32.xlu0 %v3352_v36, %s5614_s19 }
 0x3e4   : > { %3389 = vrot.lane.b32.xlu1 %v5923_v27, %s5616_s20 }
 0x3e6   : > { %3387 = vrot.lane.b32.xlu0 %v5929_v28, %s5616_s20 }
 0x3e8   : > { %3711 = vrot.lane.b32.xlu1 %v5923_v27, %s5617_s21 }
 0x3ea   : > { %3385 = vrot.lane.b32.xlu0 %v5913_v26, %s5616_s20 }
 0x3ec   : > { %3885 = vrot.lane.b32.xlu1 %v5923_v27, %s5618_s22 }
 0x3ee   : > { %3709 = vrot.lane.b32.xlu0 %v5929_v28, %s5617_s21 }
 0x3f0   : > { %4059 = vrot.lane.b32.xlu1 %v5923_v27, %s5619_s23 }
 0x3f2   : > { %3707 = vrot.lane.b32.xlu0 %v5913_v26, %s5617_s21 }
 0x3f4   : > { %4233 = vrot.lane.b32.xlu1 %v5923_v27, %s5620_s24 }
 0x3f6   : > { %3883 = vrot.lane.b32.xlu0 %v5929_v28, %s5618_s22 }
 0x3f8   : > { %4407 = vrot.lane.b32.xlu1 %v5923_v27, %s5621_s25 }
 0x3fa   : > { %3881 = vrot.lane.b32.xlu0 %v5913_v26, %s5618_s22 }
 0x3fc   : > { %4581 = vrot.lane.b32.xlu1 %v5923_v27, %s5622_s26 }
 0x3fe   : > { %4057 = vrot.lane.b32.xlu0 %v5929_v28, %s5619_s23 }
 0x402   : > { %4055 = vrot.lane.b32.xlu0 %v5913_v26, %s5619_s23 }
 0x406   : > { %4231 = vrot.lane.b32.xlu0 %v5929_v28, %s5620_s24 }
 0x40a   : > { %4229 = vrot.lane.b32.xlu0 %v5913_v26, %s5620_s24 }
 0x40e   : > { %4405 = vrot.lane.b32.xlu0 %v5929_v28, %s5621_s25 }
 0x412   : > { %4403 = vrot.lane.b32.xlu0 %v5913_v26, %s5621_s25 }
 0x416   : > { %4579 = vrot.lane.b32.xlu0 %v5929_v28, %s5622_s26 }
 0x41a   : > { %4577 = vrot.lane.b32.xlu0 %v5913_v26, %s5622_s26 }
 0x450   : > { %v3357_v37 = vpop.permute.xlu0 %3356 }
 0x451   : > { %3367 = vst.msk [vmem:[#allocation2 + $0x18] sm:$0xf] %vm382_vm2, %v3357_v37  ;;  %vm3404_vm2 = vcmask 97280  }
 0x452   : > { %v3359_v38 = vpop.permute.xlu1 %3358 }
 0x453   : > { %v3362_v39 = vsel %vm360_vm0, %v3357_v37, %v3359_v38  ;;  %v6333_v37 = vld [vmem:[%s6545_s6 + $0x10] sm:$0xf] }
 0x454   : > { %3368 = vst [vmem:[#allocation2 + $0x20] sm:$0xf] %v3362_v39  ;;  %v3361_v40 = vpop.permute.xlu0 %3360 }
 0x455   : > { %v3363_v41 = vsel %vm360_vm0, %v3359_v38, %v3361_v40  ;;  %v6351_v40 = vld [vmem:[%s6545_s6 + $0x14] sm:$0xf] }
 0x456   : > { %3369 = vst.msk [vmem:[#allocation2 + $0x28] sm:$0xf] %vm385_vm3, %v3363_v41  ;;  %v6137_v44 = vpop.permute.xlu1 %3389  ;;  %vm5153_vm3 = vcmask 551936  }
 0x458   : > { %v6131_v42 = vpop.permute.xlu0 %3387  ;;  %v6133_v43 = vld [vmem:[#allocation2 + $0x18] sm:$0xf] }
 0x459   : > { %3391 = vrot.lane.b32.xlu1 %v6133_v43, %s5616_s20 }
 0x45a   : > { %v6149_v48 = vpop.permute.xlu1 %3711 }
 0x45b   : > { %v6193_v62 = vld [vmem:[#allocation2 + $0x20] sm:$0xf] }
 0x45c   : > { %v3386_v45 = vpop.permute.xlu0 %3385 }
 0x45d   : > { %v6141_v46 = vsel %vm403_vm7, %v3386_v45, %v6131_v42  ;;  %3713 = vrot.lane.b32.xlu1 %v6133_v43, %s5617_s21  ;;  %v6145_v47 = vld [vmem:[#allocation2 + $0x28] sm:$0xf] }
 0x45e   : > { %3395 = vrot.lane.b32.xlu0 %v6145_v47, %s5616_s20  ;;  %v6166_v53 = vpop.permute.xlu1 %3885 }
 0x460   : > { %v3710_v49 = vpop.permute.xlu0 %3709 }
 0x461   : > { %3887 = vrot.lane.b32.xlu1 %v6133_v43, %s5618_s22  ;;  %v6155_v50 = vsel %vm716_vm8, %v3710_v49, %v6149_v48 }
 0x462   : > { %4753 = vrot.lane.b32.xlu0 %v5929_v28, %s5624_s27  ;;  %v6183_v58 = vpop.permute.xlu1 %4059 }
 0x464   : > { %v3708_v51 = vpop.permute.xlu0 %3707 }
 0x465   : > { %v6160_v52 = vsel %vm716_vm8, %v3708_v51, %v3710_v49  ;;  %4061 = vrot.lane.b32.xlu1 %v6133_v43, %s5619_s23  ;;  %v3398_v49 = vsel %vm403_vm7, %v6131_v42, %v6137_v44 }
 0x466   : > { %3717 = vrot.lane.b32.xlu0 %v6145_v47, %s5617_s21  ;;  %v6202_v1 = vpop.permute.xlu1 %4233 }
 0x468   : > { %v3884_v54 = vpop.permute.xlu0 %3883 }
 0x469   : > { %4235 = vrot.lane.b32.xlu1 %v6133_v43, %s5620_s24  ;;  %v6172_v55 = vsel %vm880_vm9, %v3884_v54, %v6166_v53 }
 0x46a   : > { %3891 = vrot.lane.b32.xlu0 %v6145_v47, %s5618_s22  ;;  %v6219_v7 = vpop.permute.xlu1 %4407 }
 0x46c   : > { %v3882_v56 = vpop.permute.xlu0 %3881 }
 0x46d   : > { %v6177_v57 = vsel %vm880_vm9, %v3882_v56, %v3884_v54  ;;  %4409 = vrot.lane.b32.xlu1 %v6133_v43, %s5621_s25 }
 0x46e   : > { %4065 = vrot.lane.b32.xlu0 %v6145_v47, %s5619_s23  ;;  %v6234_v15 = vpop.permute.xlu1 %4581 }
 0x470   : > { %v4058_v59 = vpop.permute.xlu0 %4057 }
 0x471   : > { %4583 = vrot.lane.b32.xlu1 %v6133_v43, %s5622_s26  ;;  %v6189_v60 = vsel %vm1044_vm10, %v4058_v59, %v6183_v58 }
 0x472   : > { %4239 = vrot.lane.b32.xlu0 %v6145_v47, %s5620_s24 }
 0x474   : > { %v4056_v61 = vpop.permute.xlu0 %4055 }
 0x475   : > { %v6196_v63 = vsel %vm1044_vm10, %v4056_v61, %v4058_v59  ;;  %3393 = vrot.lane.b32.xlu1 %v6193_v62, %s5616_s20 }
 0x476   : > { %4413 = vrot.lane.b32.xlu0 %v6145_v47, %s5621_s25 }
 0x478   : > { %v4232_v2 = vpop.permute.xlu0 %4231 }
 0x479   : > { %4757 = vrot.lane.b32.xlu1 %v6133_v43, %s5624_s27  ;;  %v6208_v4 = vsel %vm1208_vm11, %v4232_v2, %v6202_v1 }
 0x47a   : > { %4587 = vrot.lane.b32.xlu0 %v6145_v47, %s5622_s26 }
 0x47c   : > { %v4230_v5 = vpop.permute.xlu0 %4229 }
 0x47d   : > { %v6213_v6 = vsel %vm1208_vm11, %v4230_v5, %v4232_v2  ;;  %3715 = vrot.lane.b32.xlu1 %v6193_v62, %s5617_s21 }
 0x47e   : > { %4761 = vrot.lane.b32.xlu0 %v6145_v47, %s5624_s27 }
 0x480   : > { %v4406_v10 = vpop.permute.xlu0 %4405 }
 0x481   : > { %3889 = vrot.lane.b32.xlu1 %v6193_v62, %s5618_s22  ;;  %v6225_v11 = vsel %vm1372_vm12, %v4406_v10, %v6219_v7 }
 0x482   : > { %4751 = vrot.lane.b32.xlu0 %v5913_v26, %s5624_s27 }
 0x484   : > { %v4404_v12 = vpop.permute.xlu0 %4403 }
 0x485   : > { %v6230_v14 = vsel %vm1372_vm12, %v4404_v12, %v4406_v10  ;;  %4063 = vrot.lane.b32.xlu1 %v6193_v62, %s5619_s23 }
 0x488   : > { %v6236_v16 = vpop.permute.xlu0 %4579 }
 0x489   : > { %4237 = vrot.lane.b32.xlu1 %v6193_v62, %s5620_s24  ;;  %v6243_v17 = vsel %vm1536_vm13, %v6236_v16, %v6234_v15 }
 0x48c   : > { %v6256_v20 = vpop.permute.xlu0 %4577 }
 0x48d   : > { %4411 = vrot.lane.b32.xlu1 %v6193_v62, %s5621_s25 }
 0x491   : > { %4585 = vrot.lane.b32.xlu1 %v6193_v62, %s5622_s26 }
 0x495   : > { %4759 = vrot.lane.b32.xlu1 %v6193_v62, %s5624_s27 }
 0x499   : > { %4755 = vrot.lane.b32.xlu1 %v5923_v27, %s5624_s27 }
 0x49d   : > { %4926 = vperm.xlu1 %5600, %v4923_v18  }
 0x4cb   : > { %v3392_v19 = vpop.permute.xlu1 %3391 }
 0x4cf   : > { %v6258_v21 = vpop.permute.xlu1 %3713 }
 0x4d0   : > { %v3396_v22 = vpop.permute.xlu0 %3395 }
 0x4d1   : > { %5510 = vmatpush3.msk.msra.mxu1 %vm410_vm5, %v3396_v22 }
 0x4d2   : > { %5511 = vmatprep.subr.mxu1 %v5613_v0 }
 0x4d3   : > { %v6267_v24 = vpop.permute.xlu1 %3887  ;;  %5512 = vmatpush3.msra.mxu1 %v6137_v44 }
 0x4d4   : > { %5516 = vmatprep.subr.mxu1 %v5613_v0  ;;  %v6271_v25 = vpop.permute.xlu0 %4753  ;;  %5514 = vmatmul.mubr.msk.f32.vlgmr.msra.gmra.mxu1 %vm3404_vm2, %v6264_v23 }
 0x4d5   : > { %5517 = vmatpush3.msk.msra.mxu1 %vm410_vm5, %v6145_v47  ;;  %5520 = vmatprep.mubr.msk.f32.mxu1 %vm5615_vm4, %v5613_v0 }
 0x4d6   : > { %5518 = vmatprep.subr.mxu1 %v5613_v0 }
 0x4d7   : > { %v6285_v30 = vpop.permute.xlu1 %4061  ;;  %5519 = vmatpush3.msra.mxu1 %v5923_v27 }
 0x4d8   : > { %5523 = vmatprep.subr.mxu1 %v5613_v0  ;;  %v3718_v31 = vpop.permute.xlu0 %3717  ;;  %5521 = vmatmul.mubr.msk.f32.vlgmr.msra.gmra.mxu1 %vm3404_vm2, %v6282_v29 }
 0x4d9   : > { %5524 = vmatpush3.msk.msra.mxu1 %vm410_vm5, %v3718_v31  ;;  %5527 = vmatprep.mubr.msk.f32.mxu1 %vm5615_vm4, %v5613_v0 }
 0x4da   : > { %5525 = vmatprep.subr.mxu1 %v5613_v0 }
 0x4db   : > { %v6300_v33 = vpop.permute.xlu1 %4235  ;;  %5526 = vmatpush3.msra.mxu1 %v6149_v48 }
 0x4dc   : > { %5530 = vmatprep.subr.mxu1 %v5613_v0  ;;  %v6304_v27 = vpop.permute.xlu0 %3891  ;;  %5528 = vmatmul.mubr.msk.f32.vlgmr.msra.gmra.mxu1 %vm3404_vm2, %v6297_v32 }
 0x4dd   : > { %5531 = vmatpush3.msk.msra.mxu1 %vm410_vm5, %v6304_v27  ;;  %5534 = vmatprep.mubr.msk.f32.mxu1 %vm5615_vm4, %v5613_v0 }
 0x4de   : > { %5532 = vmatprep.subr.mxu1 %v5613_v0 }
 0x4df   : > { %v6318_v35 = vpop.permute.xlu1 %4409  ;;  %5533 = vmatpush3.msra.mxu1 %v6166_v53  ;;  %v6376_v53 = vld [vmem:[%s6545_s6 + $0x18] sm:$0xf] }
 0x4e0   : > { %5537 = vmatprep.subr.mxu1 %v5613_v0  ;;  %v6322_v36 = vpop.permute.xlu0 %4065  ;;  %5535 = vmatmul.mubr.msk.f32.vlgmr.msra.gmra.mxu1 %vm3404_vm2, %v6315_v34 }
 0x4e1   : > { %5538 = vmatpush3.msk.msra.mxu1 %vm410_vm5, %v6322_v36  ;;  %5541 = vmatprep.mubr.msk.f32.mxu1 %vm5615_vm4, %v5613_v0 }
 0x4e2   : > { %5539 = vmatprep.subr.mxu1 %v5613_v0 }
 0x4e3   : > { %v6336_v38 = vpop.permute.xlu1 %4583  ;;  %5540 = vmatpush3.msra.mxu1 %v6183_v58 }
 0x4e4   : > { %5544 = vmatprep.subr.mxu1 %v5613_v0  ;;  %v6340_v39 = vpop.permute.xlu0 %4239  ;;  %5542 = vmatmul.mubr.msk.f32.vlgmr.msra.gmra.mxu1 %vm3404_vm2, %v6333_v37 }
 0x4e5   : > { %5545 = vmatpush3.msk.msra.mxu1 %vm410_vm5, %v6340_v39  ;;  %5548 = vmatprep.mubr.msk.f32.mxu1 %vm5615_vm4, %v5613_v0 }
 0x4e6   : > { %5546 = vmatprep.subr.mxu1 %v5613_v0 }
 0x4e7   : > { %v3394_v41 = vpop.permute.xlu1 %3393  ;;  %5547 = vmatpush3.msra.mxu1 %v6202_v1 }
 0x4e8   : > { %v3399_v45 = vsel %vm403_vm7, %v3392_v19, %v3394_v41  ;;  %v3400_v47 = vsel %vm403_vm7, %v3394_v41, %v3396_v22  ;;  %5551 = vmatprep.subr.mxu1 %v5613_v0  ;;  %v6358_v48 = vpop.permute.xlu0 %4413  ;;  %5549 = vmatmul.mubr.msk.f32.vlgmr.msra.gmra.mxu1 %vm3404_vm2, %v6351_v40 }
 0x4e9   : > { %5297 = vmatprep.subr.msk.mxu0 %vm410_vm5, %v3400_v47  ;;  %5552 = vmatpush3.msk.msra.mxu1 %vm410_vm5, %v6358_v48 }
 0x4ea   : > { %5298 = vmatpush1.msk.msra.mxu0 %vm410_vm5, %v3399_v45  ;;  %5553 = vmatprep.subr.mxu1 %v5613_v0 }
 0x4eb   : > { %v6370_v51 = vpop.permute.xlu1 %4757  ;;  %3444 = vmatprep.subr.mxu0 %v3398_v49  ;;  %5554 = vmatpush3.msra.mxu1 %v6219_v7  ;;  %v4589_v7 = vsel %vm1536_vm13, %v6256_v20, %v6236_v16 }
 0x4ec   : > { %3445 = vmatpush1.msra.mxu0 %v6141_v46  ;;  %5555 = vmatprep.mubr.msk.f32.mxu1 %vm5615_vm4, %v5613_v0  ;;  %v6381_v54 = vpop.permute.xlu0 %4587  ;;  %v6402_v46 = vld [vmem:[%s6545_s6 + $0x1c] sm:$0xf] }
 0x4ed   : > { %5558 = vmatprep.subr.mxu1 %v5613_v0  ;;  %5299 = vmatmul.mubr.msk.f32.vlgmr.msra.gmra.mxu0 %vm3404_vm2, %v6264_v23 }
 0x4ee   : > { %5302 = vmatprep.subr.msk.mxu0 %vm410_vm5, %v6193_v62  ;;  %5556 = vmatmul.mubr.msk.f32.vlgmr.msra.gmra.mxu1 %vm3404_vm2, %v6376_v53 }
 0x4ef   : > { %5559 = vmatpush3.msk.msra.mxu1 %vm410_vm5, %v6381_v54  ;;  %5303 = vmatpush1.msk.msra.mxu0 %vm410_vm5, %v6133_v43  ;;  %v3716_v42 = vpop.permute.xlu1 %3715 }
 0x4f0   : > { %5560 = vmatprep.subr.mxu1 %v5613_v0  ;;  %3594 = vmatprep.subr.mxu0 %v5929_v28  ;;  %v3722_v44 = vsel %vm716_vm8, %v3716_v42, %v3718_v31  ;;  %v3721_v56 = vsel %vm716_vm8, %v6258_v21, %v3716_v42  ;;  %v4762_v28 = vpop.permute.xlu0 %4761 }
 0x4f1   : > { %5561 = vmatpush3.msra.mxu1 %v6234_v15  ;;  %3595 = vmatpush1.msra.mxu0 %v5913_v26 }
 0x4f2   : > { %3628 = vmatprep.mubr.f32.mxu0 %v5613_v0  ;;  %5562 = vmatprep.mubr.msk.f32.mxu1 %vm5615_vm4, %v5613_v0 }
 0x4f3   : > { %5565 = vmatprep.subr.mxu1 %v5613_v0  ;;  %5304 = vmatmul.mubr.msk.f32.vlgmr.msra.gmra.mxu0 %vm3404_vm2, %v6282_v29  ;;  %v3890_v26 = vpop.permute.xlu1 %3889 }
 0x4f4   : > { %5308 = vmatprep.subr.msk.mxu0 %vm410_vm5, %v3722_v44  ;;  %5563 = vmatmul.mubr.msk.f32.vlgmr.msra.gmra.mxu1 %vm3404_vm2, %v6402_v46  ;;  %v3896_v43 = vsel %vm880_vm9, %v3890_v26, %v6304_v27  ;;  %v3895_v58 = vsel %vm880_vm9, %v6267_v24, %v3890_v26 }
 0x4f5   : > { %5566 = vmatpush3.msk.msra.mxu1 %vm410_vm5, %v4762_v28  ;;  %5309 = vmatpush1.msk.msra.mxu0 %vm410_vm5, %v3721_v56 }
 0x4f6   : > { %3765 = vmatprep.subr.mxu0 %v6155_v50  ;;  %3799 = vmatprep.mubr.f32.mxu0 %v5613_v0 }
 0x4f7   : > { %3766 = vmatpush1.msra.mxu0 %v6160_v52  ;;  %v4064_v59 = vpop.permute.xlu1 %4063  ;;  %5567 = vmatprep.subr.mxu1 %v5613_v0 }
 0x4f8   : > { %5310 = vmatmul.mubr.msk.f32.vlgmr.msra.gmra.mxu0 %vm3404_vm2, %v6297_v32  ;;  %5314 = vmatprep.subr.msk.mxu0 %vm410_vm5, %v3896_v43  ;;  %v4070_v61 = vsel %vm1044_vm10, %v4064_v59, %v6322_v36  ;;  %v4069_v50 = vsel %vm1044_vm10, %v6285_v30, %v4064_v59 }
 0x4f9   : > { %5315 = vmatpush1.msk.msra.mxu0 %vm410_vm5, %v3895_v58  ;;  %3973 = vmatprep.mubr.f32.mxu0 %v5613_v0 }
 0x4fa   : > { %3939 = vmatprep.subr.mxu0 %v6172_v55  ;;  %5569 = vmatprep.mubr.msk.f32.mxu1 %vm5615_vm4, %v5613_v0 }
 0x4fb   : > { %3940 = vmatpush1.msra.mxu0 %v6177_v57  ;;  %v4238_v52 = vpop.permute.xlu1 %4237 }
 0x4fc   : > { %5316 = vmatmul.mubr.msk.f32.vlgmr.msra.gmra.mxu0 %vm3404_vm2, %v6315_v34  ;;  %5320 = vmatprep.subr.msk.mxu0 %vm410_vm5, %v4070_v61  ;;  %v4244_v62 = vsel %vm1208_vm11, %v4238_v52, %v6340_v39  ;;  %v4243_v55 = vsel %vm1208_vm11, %v6300_v33, %v4238_v52 }
 0x4fd   : > { %5321 = vmatpush1.msk.msra.mxu0 %vm410_vm5, %v4069_v50  ;;  %4147 = vmatprep.mubr.f32.mxu0 %v5613_v0 }
 0x4fe   : > { %4113 = vmatprep.subr.mxu0 %v6189_v60 }
 0x4ff   : > { %4114 = vmatpush1.msra.mxu0 %v6196_v63  ;;  %v4412_v57 = vpop.permute.xlu1 %4411 }
 0x500   : > { %5322 = vmatmul.mubr.msk.f32.vlgmr.msra.gmra.mxu0 %vm3404_vm2, %v6333_v37  ;;  %5326 = vmatprep.subr.msk.mxu0 %vm410_vm5, %v4244_v62  ;;  %v4418_v1 = vsel %vm1372_vm12, %v4412_v57, %v6358_v48  ;;  %v4417_v2 = vsel %vm1372_vm12, %v6318_v35, %v4412_v57 }
 0x501   : > { %5327 = vmatpush1.msk.msra.mxu0 %vm410_vm5, %v4243_v55  ;;  %4321 = vmatprep.mubr.f32.mxu0 %v5613_v0 }
 0x502   : > { %4287 = vmatprep.subr.mxu0 %v6208_v4 }
 0x503   : > { %4288 = vmatpush1.msra.mxu0 %v6213_v6  ;;  %v4586_v60 = vpop.permute.xlu1 %4585 }
 0x504   : > { %5328 = vmatmul.mubr.msk.f32.vlgmr.msra.gmra.mxu0 %vm3404_vm2, %v6351_v40  ;;  %5332 = vmatprep.subr.msk.mxu0 %vm410_vm5, %v4418_v1  ;;  %v4592_v63 = vsel %vm1536_vm13, %v4586_v60, %v6381_v54  ;;  %v4591_v5 = vsel %vm1536_vm13, %v6336_v38, %v4586_v60 }
 0x505   : > { %5333 = vmatpush1.msk.msra.mxu0 %vm410_vm5, %v4417_v2  ;;  %4495 = vmatprep.mubr.f32.mxu0 %v5613_v0 }
 0x506   : > { %4461 = vmatprep.subr.mxu0 %v6225_v11  ;;  %v4752_v11 = vpop.permute.xlu0 %4751 }
 0x507   : > { %4462 = vmatpush1.msra.mxu0 %v6230_v14  ;;  %v4760_v4 = vpop.permute.xlu1 %4759  ;;  %v5343_v14 = vld [vmem:[%s6545_s6 + $0x20] sm:$0xf]  ;;  %v4763_v16 = vsel %vm1700_vm14, %v4752_v11, %v6271_v25 }
 0x508   : > { %5334 = vmatmul.mubr.msk.f32.vlgmr.msra.gmra.mxu0 %vm3404_vm2, %v6376_v53  ;;  %5338 = vmatprep.subr.msk.mxu0 %vm410_vm5, %v4592_v63  ;;  %v4766_v6 = vsel %vm1700_vm14, %v4760_v4, %v4762_v28  ;;  %v4765_v10 = vsel %vm1700_vm14, %v6370_v51, %v4760_v4 }
 0x509   : > { %5339 = vmatpush1.msk.msra.mxu0 %vm410_vm5, %v4591_v5  ;;  %4669 = vmatprep.mubr.f32.mxu0 %v5613_v0 }
 0x50a   : > { %4635 = vmatprep.subr.mxu0 %v6243_v17 }
 0x50b   : > { %4636 = vmatpush1.msra.mxu0 %v4589_v7  ;;  %v4756_v12 = vpop.permute.xlu1 %4755 }
 0x50c   : > { %5340 = vmatmul.mubr.msk.f32.vlgmr.msra.gmra.mxu0 %vm3404_vm2, %v6402_v46  ;;  %5344 = vmatprep.subr.msk.mxu0 %vm410_vm5, %v4766_v6  ;;  %v4764_v15 = vsel %vm1700_vm14, %v6271_v25, %v4756_v12 }
 0x50d   : > { %5345 = vmatpush1.msk.msra.mxu0 %vm410_vm5, %v4765_v10  ;;  %5568 = vmatpush3.msra.mxu1 %v4756_v12 }
 0x50e   : > { %4809 = vmatprep.subr.mxu0 %v4764_v15  ;;  %5570 = vmatmul.mubr.msk.f32.vlgmr.msra.gmra.mxu1 %vm3404_vm2, %v5343_v14 }
 0x50f   : > { %4810 = vmatpush1.msra.mxu0 %v4763_v16  ;;  %4843 = vmatprep.mubr.f32.mxu0 %v5613_v0 }
 0x510   : > { %5346 = vmatmul.mubr.msk.f32.vlgmr.msra.gmra.mxu0 %vm3404_vm2, %v5343_v14  ;;  %5572 = vmatprep.subr.mxu1 %v5613_v0 }
 0x511   : > { %5576 = vmatprep.mubr.msk.f32.mxu1 %vm5615_vm4, %v5613_v0  ;;  %5067 = vmatprep.mubr.f32.mxu0 %v5613_v0 }
 0x518   : > { %v4927_v6 = vpop.permute.xlu1 %4926 }
 0x594   : > { %v3551_v17 = vpop.f32.mrf.mxu1 }
 0x596   : > { %v5515_v18 = vpop.f32.mrf.mxu1 }
 0x598   : > { %v3701_v19 = vpop.f32.mrf.mxu1 }
 0x599   : > { %v3702_v37 = vadd.f32 %v3701_v19, %v3551_v17 }
 0x59a   : > { %v5522_v20 = vpop.f32.mrf.mxu1 }
 0x59c   : > { %v3872_v21 = vpop.f32.mrf.mxu1 }
 0x59d   : > { %v3878_v41 = vadd.f32 %v3872_v21, %v3702_v37 }
 0x59e   : > { %v5529_v22 = vpop.f32.mrf.mxu1 }
 0x5a0   : > { %v4046_v23 = vpop.f32.mrf.mxu1 }
 0x5a1   : > { %v4052_v48 = vadd.f32 %v4046_v23, %v3878_v41  ;;  %v4965_v41 = vld [vmem:[%s6548_s9] sm:$0xf] }
 0x5a2   : > { %v5536_v24 = vpop.f32.mrf.mxu1 }
 0x5a4   : > { %v4220_v25 = vpop.f32.mrf.mxu1 }
 0x5a5   : > { %v4226_v53 = vadd.f32 %v4220_v25, %v4052_v48 }
 0x5a6   : > { %v5543_v29 = vpop.f32.mrf.mxu1 }
 0x5a8   : > { %v4394_v30 = vpop.f32.mrf.mxu1 }
 0x5a9   : > { %v4400_v28 = vadd.f32 %v4394_v30, %v4226_v53 }
 0x5aa   : > { %v5550_v31 = vpop.f32.mrf.mxu1 }
 0x5ad   : > { %v3480_v32 = vpop.f32.mrf.mxu0 }
 0x5ae   : > { %v4568_v33 = vpop.f32.mrf.mxu1 }
 0x5af   : > { %v3482_v27 = vpop.f32.mrf.mxu0  ;;  %v4574_v52 = vadd.f32 %v4568_v33, %v4400_v28 }
 0x5b0   : > { %v5557_v34 = vpop.f32.mrf.mxu1 }
 0x5b3   : > { %v3630_v35 = vpop.f32.mrf.mxu0 }
 0x5b4   : > { %v4742_v36 = vpop.f32.mrf.mxu1  ;;  %v3631_v42 = vadd.f32 %v3630_v35, %v3480_v32 }
 0x5b5   : > { %v3632_v38 = vpop.f32.mrf.mxu0  ;;  %v4748_v2 = vadd.f32 %v4742_v36, %v4574_v52 }
 0x5b6   : > { %v5564_v39 = vpop.f32.mrf.mxu1  ;;  %v3633_v46 = vadd.f32 %v3632_v38, %v3482_v27  ;;  %v4959_v27 = vld [vmem:[#allocation2 + $0x8] sm:$0xff] }
 0x5b7   : > { %v4960_v39 = vld [vmem:[#allocation2 + $0x10] sm:$0xff] }
 0x5b8   : > { %v3801_v40 = vpop.f32.mrf.mxu0 }
 0x5b9   : > { %v3876_v56 = vadd.f32 %v3801_v40, %v3631_v42  ;;  %v4958_v40 = vld [vmem:[#allocation2] sm:$0xff] }
 0x5ba   : > { %v3803_v45 = vpop.f32.mrf.mxu0 }
 0x5bb   : > { %v3877_v43 = vadd.f32 %v3803_v45, %v3633_v46 }
 0x5bc   : > { %v3975_v47 = vpop.f32.mrf.mxu0 }
 0x5bd   : > { %v4050_v58 = vadd.f32 %v3975_v47, %v3876_v56 }
 0x5be   : > { %v3977_v49 = vpop.f32.mrf.mxu0 }
 0x5bf   : > { %v4051_v61 = vadd.f32 %v3977_v49, %v3877_v43 }
 0x5c0   : > { %v4149_v51 = vpop.f32.mrf.mxu0 }
 0x5c1   : > { %v4224_v50 = vadd.f32 %v4149_v51, %v4050_v58 }
 0x5c2   : > { %v4151_v54 = vpop.f32.mrf.mxu0 }
 0x5c3   : > { %v4225_v55 = vadd.f32 %v4151_v54, %v4051_v61  ;;  %v4964_v54 = vld [vmem:[%s6547_s8] sm:$0xf] }
 0x5c4   : > { %v4323_v44 = vpop.f32.mrf.mxu0 }
 0x5c5   : > { %v4398_v57 = vadd.f32 %v4323_v44, %v4224_v50 }
 0x5c6   : > { %v4325_v26 = vpop.f32.mrf.mxu0 }
 0x5c7   : > { %v4399_v60 = vadd.f32 %v4325_v26, %v4225_v55  ;;  %v5604_v55 = vld [vmem:[%s5704_s18] sm:$0xff] }
 0x5c8   : > { %v4497_v59 = vpop.f32.mrf.mxu0 }
 0x5c9   : > { %v4572_v63 = vadd.f32 %v4497_v59, %v4398_v57  ;;  %v5603_v59 = vld [vmem:[%s5704_s18 + $0x8] sm:$0xf] }
 0x5ca   : > { %v4499_v62 = vpop.f32.mrf.mxu0 }
 0x5cb   : > { %v4573_v7 = vadd.f32 %v4499_v62, %v4399_v60 }
 0x5cc   : > { %v4671_v1 = vpop.f32.mrf.mxu0 }
 0x5cd   : > { %v4746_v10 = vadd.f32 %v4671_v1, %v4572_v63 }
 0x5ce   : > { %v4673_v5 = vpop.f32.mrf.mxu0  ;;  %v4916_v4 = vpop.f32.mrf.mxu1 }
 0x5cf   : > { %v4922_v11 = vadd.f32 %v4916_v4, %v4748_v2  ;;  %v4747_v15 = vadd.f32 %v4673_v5, %v4573_v7 }
 0x5d0   : > { %v4845_v12 = vpop.f32.mrf.mxu0  ;;  %v5571_v14 = vpop.f32.mrf.mxu1 }
 0x5d1   : > { %v4931_v16 = vadd.f32 %v4927_v6, %v4922_v11  ;;  %v4920_v17 = vadd.f32 %v4845_v12, %v4746_v10 }
 0x5d2   : > { %v4847_v18 = vpop.f32.mrf.mxu0 }
 0x5d3   : > { %v4929_v19 = vadd.f32 %v4927_v6, %v4920_v17  ;;  %v4921_v20 = vadd.f32 %v4847_v18, %v4747_v15  ;;  %v4934_v21 = vmax.f32 %v4931_v16, 0.0 }
 0x5d5   : > { %v4932_v22 = vmax.f32 %v4929_v19, 0.0  ;;  %v4930_v23 = vadd.f32 %v4927_v6, %v4921_v20  ;;  %v4937_v29 = vmul.f32 %v4934_v21, %v5899_v9 }
 0x5d7   : > { %v4935_v24 = vmul.f32 %v4932_v22, %v5897_v8  ;;  %v4933_v25 = vmax.f32 %v4930_v23, 0.0  ;;  %v4943_v33 = vrot.slane %v4937_v29, 4 }
 0x5d9   : > { %v4941_v30 = vrot.slane %v4935_v24, 4  ;;  %v4936_v31 = vmul.f32 %v4933_v25, %v5901_v13 }
 0x5db   : > { %v4942_v32 = vrot.slane %v4936_v31, 4  ;;  %4944 = vrot.lane.b32.xlu0 %v4941_v30, %s5614_s19 }
 0x5dd   : > { %4946 = vrot.lane.b32.xlu1 %v4942_v32, %s5614_s19 }
 0x5df   : > { %4948 = vrot.lane.b32.xlu0 %v4943_v33, %s5614_s19 }
 0x5e3   : > { %4979 = vrot.lane.b32.xlu0 %v4959_v27, %s5619_s23 }
 0x64d   : > { %v4945_v34 = vpop.permute.xlu0 %4944 }
 0x64e   : > { %4955 = vst.msk [vmem:[#allocation2 + $0x18] sm:$0xf0] %vm1904_vm15, %v4945_v34 }
 0x64f   : > { %v4947_v8 = vpop.permute.xlu1 %4946 }
 0x650   : > { %v4950_v9 = vsel %vm360_vm0, %v4945_v34, %v4947_v8 }
 0x651   : > { %4956 = vst [vmem:[#allocation2 + $0x20] sm:$0xf0] %v4950_v9  ;;  %v4949_v35 = vpop.permute.xlu0 %4948 }
 0x652   : > { %v4951_v13 = vsel %vm360_vm0, %v4947_v8, %v4949_v35  ;;  %vm4999_vm0 = vcmask 130048  }
 0x653   : > { %4957 = vst.msk [vmem:[#allocation2 + $0x28] sm:$0xf0] %vm1907_vm1, %v4951_v13 }
 0x655   : > { %v4961_v36 = vld [vmem:[#allocation2 + $0x18] sm:$0xff]  ;;  %v4980_v47 = vpop.permute.xlu0 %4979 }
 0x656   : > { %4983 = vrot.lane.b32.xlu1 %v4961_v36, %s5619_s23 }
 0x658   : > { %v4962_v37 = vld [vmem:[#allocation2 + $0x20] sm:$0xff] }
 0x65a   : > { %4985 = vrot.lane.b32.xlu1 %v4962_v37, %s5619_s23  ;;  %v4963_v38 = vld [vmem:[#allocation2 + $0x28] sm:$0xff] }
 0x65b   : > { %4987 = vrot.lane.b32.xlu0 %v4963_v38, %s5619_s23 }
 0x65e   : > { %4981 = vrot.lane.b32.xlu1 %v4960_v39, %s5619_s23 }
 0x65f   : > { %4977 = vrot.lane.b32.xlu0 %v4958_v40, %s5619_s23 }
 0x662   : > { %4968 = vperm.xlu1 %5600, %v4965_v41  }
 0x6c8   : > { %v4984_v45 = vpop.permute.xlu1 %4983 }
 0x6cc   : > { %v4986_v48 = vpop.permute.xlu1 %4985 }
 0x6cd   : > { %v4988_v49 = vpop.permute.xlu0 %4987  ;;  %v4991_v53 = vsel %vm1044_vm10, %v4984_v45, %v4986_v48 }
 0x6ce   : > { %5573 = vmatpush3.msra.mxu1 %v4988_v49  ;;  %v4992_v51 = vsel %vm1044_vm10, %v4986_v48, %v4988_v49 }
 0x6cf   : > { %5031 = vmatprep.subr.mxu0 %v4992_v51  ;;  %5574 = vmatprep.subr.mxu1 %v5613_v0 }
 0x6d0   : > { %5032 = vmatpush1.msra.mxu0 %v4991_v53  ;;  %v4982_v42 = vpop.permute.xlu1 %4981 }
 0x6d1   : > { %v4978_v44 = vpop.permute.xlu0 %4977  ;;  %5575 = vmatpush3.msra.mxu1 %v4982_v42  ;;  %v4990_v46 = vsel %vm1044_vm10, %v4980_v47, %v4982_v42 }
 0x6d2   : > { %v4989_v56 = vsel %vm1044_vm10, %v4978_v44, %v4980_v47  ;;  %5033 = vmatprep.subr.mxu0 %v4990_v46  ;;  %5577 = vmatmul.mubr.msk.f32.vlgmr.msra.gmra.mxu1 %vm4999_vm0, %v4964_v54 }
 0x6d3   : > { %5034 = vmatpush1.msra.mxu0 %v4989_v56 }
 0x6d4   : > { %5349 = vmatmul.mubr.msk.f32.vlgmr.msra.gmra.mxu0 %vm4999_vm0, %v4964_v54 }
 0x6dd   : > { %v4969_v0 = vpop.permute.xlu1 %4968 }
 0x792   : > { %v5140_v28 = vpop.f32.mrf.mxu1 }
 0x793   : > { %v5141_v26 = vadd.f32 %v5140_v28, %v4969_v0 }
 0x794   : > { %v5069_v43 = vpop.f32.mrf.mxu0  ;;  %v5578_v58 = vpop.f32.mrf.mxu1 }
 0x795   : > { %v5147_v61 = vadd.f32 %v5603_v59, %v5141_v26  ;;  %v5070_v50 = vadd.f32 %v5069_v43, %v4969_v0 }
 0x796   : > { %v5071_v52 = vpop.f32.mrf.mxu0 }
 0x797   : > { %5154 = vst.msk [vmem:[%s359_s11 + $0x8] sm:$0xf] %vm5153_vm3, %v5147_v61  ;;  %v5072_v62 = vadd.f32 %v5071_v52, %v4969_v0  ;;  %v5145_v57 = vadd.f32 %v5604_v55, %v5070_v50 }
 0x799   : > { %v5146_v1 = vadd.f32 %v5072_v62, %v5709_v3 }
 0x79b   : > { %v5150_v2 = vcombine.low %v5145_v57, %v5146_v1 }
 0x79d   : > { %5152 = vst [vmem:[%s359_s11] sm:$0xff] %v5150_v2 }
 0x79e PF: > { %s20_s13 = sadd.s32 1, %s5611_s13  }
 0x79f   : > { %p17_p4 = scmp.ge.s32.totalorder %s20_s13, 4  }
 0x7a1   :  { %19 = sbr.rel (!%p17_p4) target bundleno = 1 (0x1), region = 114 }

</bundles_post_ra>
